<compile_context>
chip_gen: v6e
topology: v6e:2x2x1
jax: 0.10.0
libtpu: 0.0.40
codegen_flags: <defaults>
</compile_context>

<pallas_src>
import numpy as np
import jax
import jax.numpy as jnp
from jax import lax
from jax.experimental import pallas as pl
from jax.experimental.pallas import tpu as pltpu

B = 2
T = 750            # Linear(736, 2) forces 32*floor(floor(T/4)/8) = 736
TP = 768           # T padded to a lane multiple
T1 = T // 4        # 187
T1P = 256          # T1 padded to a lane multiple
T2 = T1 // 8       # 23
K1 = 51
K3 = 15
EPS = 1e-5
HIGH = jax.lax.Precision.HIGHEST   # reference only


def _elu(v):
    return jnp.where(v > 0, v, jnp.exp(jnp.minimum(v, 0.0)) - 1.0)


# --------------------------- Pallas kernel -----------------------------------
def eegnet_kernel(x_ref, w12_ref, p1m_ref, w3_ref, wcls_ref, bc_ref, out_ref):
    # ---- stage 1+2: fused first_conv+BN1+depthwise_conv+BN2, one MXU matmul ----
    w12 = w12_ref[...]                                     # (32, 103) bf16
    z2 = jnp.dot(w12[:, :2 * K1], x_ref[0],                # (32,102)@(102,768)
                 preferred_element_type=jnp.float32)
    z2 = z2 + w12[:, 2 * K1:].astype(jnp.float32)          # + folded bias column
    h2 = _elu(z2)                                          # (32, 768) f32

    # ---- avg-pool (1,4) as a bf16 matmul; columns >= 187 are exactly zero ----
    p1 = jnp.dot(h2.astype(jnp.bfloat16), p1m_ref[...],
                 preferred_element_type=jnp.float32)       # (32, 256) f32

    # ---- stage 3: separable conv + BN3 as ONE matmul over (tap, channel) ----
    shifted = [p1 if k == 7 else pltpu.roll(p1, (7 - k) % T1P, axis=1)
               for k in range(K3)]                         # 15 x (32, 256)
    x3 = jnp.concatenate(shifted, axis=0)                  # (480, 256)
    w3 = w3_ref[...]                                       # (32, 481) f32
    h3 = _elu(jnp.dot(w3[:, :K3 * 32], x3,
                      preferred_element_type=jnp.float32)
              + w3[:, K3 * 32:])                           # (32, 256)

    # ---- avg-pool (1,8) + Linear(736, 2), pool folded into the weight ----
    prod = wcls_ref[...] * h3[None, :, :]                  # (2, 32, 256)
    logits = jnp.sum(jnp.sum(prod, axis=2), axis=1) + bc_ref[0]
    out_ref[0, 0, :] = logits


# --------------------------- wrapper ------------------------------------------
def _bn_fold(gamma, beta, mean, var):
    s = gamma / jnp.sqrt(var + EPS)
    return s, beta - mean * s


def eegnet_forward(x, p):
    f32, bf16 = jnp.float32, jnp.bfloat16
    s1, b1 = _bn_fold(p["g1"], p["b1"], p["m1"], p["v1"])          # (16,)
    s2, b2 = _bn_fold(p["g2"], p["b2"], p["m2"], p["v2"])          # (32,)
    s3, b3 = _bn_fold(p["g3"], p["b3"], p["m3"], p["v3"])          # (32,)

    # ---- fold first_conv + BN1 + depthwise conv + BN2 into (32,102) + bias ----
    w1m = p["w1"][:, 0, 0, :]                                      # (16, 51)
    w2m = p["w2"][:, 0, :, 0]                                      # (32, 2)
    grp = jnp.arange(32) // 2                                      # depthwise group
    W12 = (s2[:, None, None] * w2m[:, :, None]
           * s1[grp][:, None, None] * w1m[grp][:, None, :])        # (32, 2, 51)
    W12 = W12.reshape(32, 2 * K1)                                  # [o, e*51+k]
    b12 = s2 * b1[grp] * (w2m[:, 0] + w2m[:, 1]) + b2              # (32,)
    w12a = jnp.concatenate([W12, b12[:, None]], axis=1).astype(bf16)   # (32, 103)

    # ---- im2col of the zero-padded input: X[b, e*51+k, t] = xpad[b, e, t+k] ----
    xp = jnp.pad(x[:, 0], ((0, 0), (0, 0), (25, 25)))              # (B, 2, 800)
    cols = jnp.stack([xp[:, :, k:k + T] for k in range(K1)], axis=2)   # (B,2,51,750)
    X = cols.reshape(B, 2 * K1, T)
    X = jnp.pad(X, ((0, 0), (0, 0), (0, TP - T))).astype(bf16)     # (B, 102, 768)

    # ---- avg-pool (1,4) matrix, bf16 (exact 0.25); cols >= 187 zero ----
    t_i = jnp.arange(TP)[:, None]
    u_i = jnp.arange(T1P)[None, :]
    p1m = ((t_i // 4 == u_i) & (u_i < T1)).astype(bf16) * 0.25     # (768, 256)

    # ---- separable conv + BN3 folded to (32, 480) weight + bias column ----
    w3 = jnp.transpose(p["w3"][:, :, 0, :], (0, 2, 1)).reshape(32, K3 * 32)
    w3a = jnp.concatenate([s3[:, None] * w3, b3[:, None]], axis=1)  # (32, 481)

    # ---- avg-pool (1,8) folded into the classifier weight (2, 32, 256) ----
    wcr = p["wc"].reshape(2, 32, T2)                               # flatten(1) order
    sel = (jnp.arange(T1P)[None, :] // 8
           == jnp.arange(T2)[:, None]).astype(f32)                 # (23, 256)
    wcls = jnp.einsum("jov,vu->jou", wcr, sel) * 0.125             # (2, 32, 256)
    bc2 = p["bc"].reshape(1, 2)

    out = pl.pallas_call(
        eegnet_kernel,
        out_shape=jax.ShapeDtypeStruct((B, 1, 2), jnp.float32),
        grid=(B,),
        in_specs=[
            pl.BlockSpec((1, 2 * K1, TP), lambda i: (i, 0, 0)),    # per-batch im2col
            pl.BlockSpec((32, 2 * K1 + 1), lambda i: (0, 0)),      # fused conv1+2
            pl.BlockSpec((TP, T1P), lambda i: (0, 0)),             # pool-4 matrix
            pl.BlockSpec((32, K3 * 32 + 1), lambda i: (0, 0)),     # fused conv3
            pl.BlockSpec((2, 32, T1P), lambda i: (0, 0, 0)),       # pool8+classifier
            pl.BlockSpec((1, 2), lambda i: (0, 0)),                # classifier bias
        ],
        out_specs=pl.BlockSpec((1, 1, 2), lambda i: (i, 0, 0)),
        compiler_params=pltpu.CompilerParams(
            dimension_semantics=("parallel",),
            vmem_limit_bytes=16 * 1024 * 1024),
    )(X, w12a, p1m, w3a, wcls, bc2)
    return out[:, 0, :]


# --------------------------- pure-JAX reference -------------------------------
def eegnet_reference(x, p):
    dn = ("NCHW", "OIHW", "NCHW")

    def bn(h, g, be, m, v):
        return ((h - m[None, :, None, None]) / jnp.sqrt(v[None, :, None, None] + EPS)
                * g[None, :, None, None] + be[None, :, None, None])

    h = lax.conv_general_dilated(x, p["w1"], (1, 1), [(0, 0), (25, 25)],
                                 dimension_numbers=dn, precision=HIGH)
    h = bn(h, p["g1"], p["b1"], p["m1"], p["v1"])
    h = lax.conv_general_dilated(h, p["w2"], (1, 1), [(0, 0), (0, 0)],
                                 dimension_numbers=dn, feature_group_count=16,
                                 precision=HIGH)
    h = _elu(bn(h, p["g2"], p["b2"], p["m2"], p["v2"]))
    h = h[..., : T1 * 4].reshape(B, 32, 1, T1, 4).mean(axis=-1)
    h = lax.conv_general_dilated(h, p["w3"], (1, 1), [(0, 0), (7, 7)],
                                 dimension_numbers=dn, precision=HIGH)
    h = _elu(bn(h, p["g3"], p["b3"], p["m3"], p["v3"]))
    h = h[..., : T2 * 8].reshape(B, 32, 1, T2, 8).mean(axis=-1)
    flat = h.reshape(B, 32 * T2)
    return jnp.dot(flat, p["wc"].T, precision=HIGH) + p["bc"][None, :]


# --------------------------- deterministic init & run --------------------------
def init_params(key):
    ks = jax.random.split(key, 17)
    f32 = jnp.float32
    return {
        "w1": 0.1 * jax.random.normal(ks[0], (16, 1, 1, 51), f32),
        "g1": 1.0 + 0.1 * jax.random.normal(ks[1], (16,), f32),
        "b1": 0.1 * jax.random.normal(ks[2], (16,), f32),
        "m1": 0.1 * jax.random.normal(ks[3], (16,), f32),
        "v1": jax.random.uniform(ks[4], (16,), f32, 0.5, 1.5),
        "w2": 0.1 * jax.random.normal(ks[5], (32, 1, 2, 1), f32),
        "g2": 1.0 + 0.1 * jax.random.normal(ks[6], (32,), f32),
        "b2": 0.1 * jax.random.normal(ks[7], (32,), f32),
        "m2": 0.1 * jax.random.normal(ks[8], (32,), f32),
        "v2": jax.random.uniform(ks[9], (32,), f32, 0.5, 1.5),
        "w3": 0.1 * jax.random.normal(ks[10], (32, 32, 1, 15), f32),
        "g3": 1.0 + 0.1 * jax.random.normal(ks[11], (32,), f32),
        "b3": 0.1 * jax.random.normal(ks[12], (32,), f32),
        "m3": 0.1 * jax.random.normal(ks[13], (32,), f32),
        "v3": jax.random.uniform(ks[14], (32,), f32, 0.5, 1.5),
        "wc": 0.05 * jax.random.normal(ks[15], (2, 32 * T2), f32),
        "bc": 0.05 * jax.random.normal(ks[16], (2,), f32),
    }


if __name__ == "__main__":
    key = jax.random.PRNGKey(0)
    kx, kp = jax.random.split(key)
    params = init_params(kp)
    x = jax.random.normal(kx, (B, 1, 2, T), jnp.float32)   # NCHW, 2 electrodes x 750 samples

    out = jax.block_until_ready(jax.jit(eegnet_forward)(x, params))
    ref = jax.block_until_ready(jax.jit(eegnet_reference)(x, params))

    assert out.shape == (B, 2) and out.dtype == jnp.float32
    np.testing.assert_allclose(np.asarray(out), np.asarray(ref), rtol=5e-2, atol=5e-2)
    print("KERNEL_OK")
</pallas_src>

<mosaic_0001>
module attributes {stable_mosaic.version = 11 : i64} {
  func.func @eegnet_kernel(%arg0: i32, %arg1: memref<1x102x768xbf16, #tpu.memory_space<vmem>>, %arg2: memref<32x103xbf16, #tpu.memory_space<vmem>>, %arg3: memref<768x256xbf16, #tpu.memory_space<vmem>>, %arg4: memref<32x481xf32, #tpu.memory_space<vmem>>, %arg5: memref<2x32x256xf32, #tpu.memory_space<vmem>>, %arg6: memref<1x2xf32, #tpu.memory_space<vmem>>, %arg7: memref<1x1x2xf32, #tpu.memory_space<vmem>>) attributes {dimension_semantics = [#tpu.dimension_semantics<parallel>], iteration_bounds = array<i64: 2>, scalar_prefetch = 0 : i64, scratch_operands = 0 : i64, tpu.core_type = #tpu.core_type<tc>, window_params = [{transform_indices = @transform_0, window_bounds = array<i64: 1, 102, 768>}, {pipeline_mode = #tpu.pipeline_mode<synchronous>, transform_indices = @transform_1, window_bounds = array<i64: 32, 103>}, {pipeline_mode = #tpu.pipeline_mode<synchronous>, transform_indices = @transform_2, window_bounds = array<i64: 768, 256>}, {pipeline_mode = #tpu.pipeline_mode<synchronous>, transform_indices = @transform_3, window_bounds = array<i64: 32, 481>}, {pipeline_mode = #tpu.pipeline_mode<synchronous>, transform_indices = @transform_4, window_bounds = array<i64: 2, 32, 256>}, {pipeline_mode = #tpu.pipeline_mode<synchronous>, transform_indices = @transform_5, window_bounds = array<i64: 1, 2>}, {transform_indices = @transform_6, window_bounds = array<i64: 1, 1, 2>}]} {
    %c0 = arith.constant 0 : index
    %c0_0 = arith.constant 0 : index
    %0 = vector.load %arg2[%c0, %c0_0] : memref<32x103xbf16, #tpu.memory_space<vmem>>, vector<32x103xbf16>
    %1 = vector.extract_strided_slice %0 {offsets = [0, 0], sizes = [32, 102], strides = [1, 1]} : vector<32x103xbf16> to vector<32x102xbf16>
    %c0_1 = arith.constant 0 : index
    %c0_2 = arith.constant 0 : index
    %c0_3 = arith.constant 0 : index
    %2 = vector.load %arg1[%c0_1, %c0_2, %c0_3] : memref<1x102x768xbf16, #tpu.memory_space<vmem>>, vector<1x102x768xbf16>
    %3 = vector.shape_cast %2 : vector<1x102x768xbf16> to vector<102x768xbf16>
    %cst = arith.constant dense<0.000000e+00> : vector<32x768xf32>
    %4 = tpu.matmul %1, %3, %cst {dimension_numbers = #tpu.dot_dimension_numbers<[1], [0], [0], [1], [0, 0, 1, 1], [], []>} : vector<32x102xbf16>, vector<102x768xbf16>, vector<32x768xf32> -> vector<32x768xf32>
    %5 = vector.extract_strided_slice %0 {offsets = [0, 102], sizes = [32, 1], strides = [1, 1]} : vector<32x103xbf16> to vector<32x1xbf16>
    %6 = arith.extf %5 : vector<32x1xbf16> to vector<32x1xf32>
    %7 = vector.broadcast %6 : vector<32x1xf32> to vector<32x768xf32>
    %8 = arith.addf %4, %7 : vector<32x768xf32>
    %cst_4 = arith.constant 0.000000e+00 : f32
    %9 = vector.broadcast %cst_4 : f32 to vector<32x768xf32>
    %10 = arith.cmpf ogt, %8, %9 : vector<32x768xf32>
    %cst_5 = arith.constant 0.000000e+00 : f32
    %11 = vector.broadcast %cst_5 : f32 to vector<32x768xf32>
    %12 = arith.minimumf %8, %11 : vector<32x768xf32>
    %13 = math.exp %12 : vector<32x768xf32>
    %cst_6 = arith.constant 1.000000e+00 : f32
    %14 = vector.broadcast %cst_6 : f32 to vector<32x768xf32>
    %15 = arith.subf %13, %14 : vector<32x768xf32>
    %16 = arith.select %10, %8, %15 : vector<32x768xi1>, vector<32x768xf32>
    %17 = arith.truncf %16 : vector<32x768xf32> to vector<32x768xbf16>
    %c0_7 = arith.constant 0 : index
    %c0_8 = arith.constant 0 : index
    %18 = vector.load %arg3[%c0_7, %c0_8] : memref<768x256xbf16, #tpu.memory_space<vmem>>, vector<768x256xbf16>
    %cst_9 = arith.constant dense<0.000000e+00> : vector<32x256xf32>
    %19 = tpu.matmul %17, %18, %cst_9 {dimension_numbers = #tpu.dot_dimension_numbers<[1], [0], [0], [1], [0, 0, 1, 1], [], []>} : vector<32x768xbf16>, vector<768x256xbf16>, vector<32x256xf32> -> vector<32x256xf32>
    %c7_i32 = arith.constant 7 : i32
    %20 = tpu.dynamic_rotate %19 by %c7_i32 dim 1 : vector<32x256xf32>, i32 -> vector<32x256xf32>
    %c6_i32 = arith.constant 6 : i32
    %21 = tpu.dynamic_rotate %19 by %c6_i32 dim 1 : vector<32x256xf32>, i32 -> vector<32x256xf32>
    %c5_i32 = arith.constant 5 : i32
    %22 = tpu.dynamic_rotate %19 by %c5_i32 dim 1 : vector<32x256xf32>, i32 -> vector<32x256xf32>
    %c4_i32 = arith.constant 4 : i32
    %23 = tpu.dynamic_rotate %19 by %c4_i32 dim 1 : vector<32x256xf32>, i32 -> vector<32x256xf32>
    %c3_i32 = arith.constant 3 : i32
    %24 = tpu.dynamic_rotate %19 by %c3_i32 dim 1 : vector<32x256xf32>, i32 -> vector<32x256xf32>
    %c2_i32 = arith.constant 2 : i32
    %25 = tpu.dynamic_rotate %19 by %c2_i32 dim 1 : vector<32x256xf32>, i32 -> vector<32x256xf32>
    %c1_i32 = arith.constant 1 : i32
    %26 = tpu.dynamic_rotate %19 by %c1_i32 dim 1 : vector<32x256xf32>, i32 -> vector<32x256xf32>
    %c255_i32 = arith.constant 255 : i32
    %27 = tpu.dynamic_rotate %19 by %c255_i32 dim 1 : vector<32x256xf32>, i32 -> vector<32x256xf32>
    %c254_i32 = arith.constant 254 : i32
    %28 = tpu.dynamic_rotate %19 by %c254_i32 dim 1 : vector<32x256xf32>, i32 -> vector<32x256xf32>
    %c253_i32 = arith.constant 253 : i32
    %29 = tpu.dynamic_rotate %19 by %c253_i32 dim 1 : vector<32x256xf32>, i32 -> vector<32x256xf32>
    %c252_i32 = arith.constant 252 : i32
    %30 = tpu.dynamic_rotate %19 by %c252_i32 dim 1 : vector<32x256xf32>, i32 -> vector<32x256xf32>
    %c251_i32 = arith.constant 251 : i32
    %31 = tpu.dynamic_rotate %19 by %c251_i32 dim 1 : vector<32x256xf32>, i32 -> vector<32x256xf32>
    %c250_i32 = arith.constant 250 : i32
    %32 = tpu.dynamic_rotate %19 by %c250_i32 dim 1 : vector<32x256xf32>, i32 -> vector<32x256xf32>
    %c249_i32 = arith.constant 249 : i32
    %33 = tpu.dynamic_rotate %19 by %c249_i32 dim 1 : vector<32x256xf32>, i32 -> vector<32x256xf32>
    %34 = tpu.concatenate %20, %21, %22, %23, %24, %25, %26, %19, %27, %28, %29, %30, %31, %32, %33 in 0 : vector<32x256xf32>, vector<32x256xf32>, vector<32x256xf32>, vector<32x256xf32>, vector<32x256xf32>, vector<32x256xf32>, vector<32x256xf32>, vector<32x256xf32>, vector<32x256xf32>, vector<32x256xf32>, vector<32x256xf32>, vector<32x256xf32>, vector<32x256xf32>, vector<32x256xf32>, vector<32x256xf32> -> vector<480x256xf32>
    %c0_10 = arith.constant 0 : index
    %c0_11 = arith.constant 0 : index
    %35 = vector.load %arg4[%c0_10, %c0_11] : memref<32x481xf32, #tpu.memory_space<vmem>>, vector<32x481xf32>
    %36 = vector.extract_strided_slice %35 {offsets = [0, 0], sizes = [32, 480], strides = [1, 1]} : vector<32x481xf32> to vector<32x480xf32>
    %cst_12 = arith.constant dense<0.000000e+00> : vector<32x256xf32>
    %37 = tpu.matmul %36, %34, %cst_12 {dimension_numbers = #tpu.dot_dimension_numbers<[1], [0], [0], [1], [0, 0, 1, 1], [], []>} : vector<32x480xf32>, vector<480x256xf32>, vector<32x256xf32> -> vector<32x256xf32>
    %38 = vector.extract_strided_slice %35 {offsets = [0, 480], sizes = [32, 1], strides = [1, 1]} : vector<32x481xf32> to vector<32x1xf32>
    %39 = vector.broadcast %38 : vector<32x1xf32> to vector<32x256xf32>
    %40 = arith.addf %37, %39 : vector<32x256xf32>
    %cst_13 = arith.constant 0.000000e+00 : f32
    %41 = vector.broadcast %cst_13 : f32 to vector<32x256xf32>
    %42 = arith.cmpf ogt, %40, %41 : vector<32x256xf32>
    %cst_14 = arith.constant 0.000000e+00 : f32
    %43 = vector.broadcast %cst_14 : f32 to vector<32x256xf32>
    %44 = arith.minimumf %40, %43 : vector<32x256xf32>
    %45 = math.exp %44 : vector<32x256xf32>
    %cst_15 = arith.constant 1.000000e+00 : f32
    %46 = vector.broadcast %cst_15 : f32 to vector<32x256xf32>
    %47 = arith.subf %45, %46 : vector<32x256xf32>
    %48 = arith.select %42, %40, %47 : vector<32x256xi1>, vector<32x256xf32>
    %c0_16 = arith.constant 0 : index
    %c0_17 = arith.constant 0 : index
    %c0_18 = arith.constant 0 : index
    %49 = vector.load %arg5[%c0_16, %c0_17, %c0_18] : memref<2x32x256xf32, #tpu.memory_space<vmem>>, vector<2x32x256xf32>
    %50 = vector.shape_cast %48 : vector<32x256xf32> to vector<1x32x256xf32>
    %51 = vector.broadcast %50 : vector<1x32x256xf32> to vector<2x32x256xf32>
    %52 = arith.mulf %49, %51 : vector<2x32x256xf32>
    %cst_19 = arith.constant dense<0.000000e+00> : vector<2x32xf32>
    %53 = vector.multi_reduction <add>, %52, %cst_19 [2] : vector<2x32x256xf32> to vector<2x32xf32>
    %cst_20 = arith.constant dense<0.000000e+00> : vector<2xf32>
    %54 = vector.multi_reduction <add>, %53, %cst_20 [1] : vector<2x32xf32> to vector<2xf32>
    %c0_21 = arith.constant 0 : index
    %c0_22 = arith.constant 0 : index
    %55 = vector.load %arg6[%c0_21, %c0_22] : memref<1x2xf32, #tpu.memory_space<vmem>>, vector<1x2xf32>
    %56 = vector.shape_cast %55 : vector<1x2xf32> to vector<2xf32>
    %57 = arith.addf %54, %56 : vector<2xf32>
    %c0_23 = arith.constant 0 : index
    %c0_24 = arith.constant 0 : index
    %c0_25 = arith.constant 0 : index
    %58 = vector.load %arg7[%c0_23, %c0_24, %c0_25] : memref<1x1x2xf32, #tpu.memory_space<vmem>>, vector<1x1x2xf32>
    %59 = vector.shape_cast %58 : vector<1x1x2xf32> to vector<2xf32>
    %60 = vector.shape_cast %57 : vector<2xf32> to vector<1x1x2xf32>
    tpu.vector_store %arg7[%c0_23, %c0_24, %c0_25], %60 {strides = array<i32>} : memref<1x1x2xf32, #tpu.memory_space<vmem>>, vector<1x1x2xf32>,
    return
  }
  func.func @transform_0(%arg0: i32) -> (i32, i32, i32) {
    %c0_i32 = arith.constant 0 : i32
    %c0_i32_0 = arith.constant 0 : i32
    %c0_i32_1 = arith.constant 0 : i32
    return %arg0, %c0_i32, %c0_i32_0 : i32, i32, i32
  }
  func.func @transform_1(%arg0: i32) -> (i32, i32) {
    %c0_i32 = arith.constant 0 : i32
    %c0_i32_0 = arith.constant 0 : i32
    %c0_i32_1 = arith.constant 0 : i32
    return %c0_i32, %c0_i32_0 : i32, i32
  }
  func.func @transform_2(%arg0: i32) -> (i32, i32) {
    %c0_i32 = arith.constant 0 : i32
    %c0_i32_0 = arith.constant 0 : i32
    %c0_i32_1 = arith.constant 0 : i32
    return %c0_i32, %c0_i32_0 : i32, i32
  }
  func.func @transform_3(%arg0: i32) -> (i32, i32) {
    %c0_i32 = arith.constant 0 : i32
    %c0_i32_0 = arith.constant 0 : i32
    %c0_i32_1 = arith.constant 0 : i32
    return %c0_i32, %c0_i32_0 : i32, i32
  }
  func.func @transform_4(%arg0: i32) -> (i32, i32, i32) {
    %c0_i32 = arith.constant 0 : i32
    %c0_i32_0 = arith.constant 0 : i32
    %c0_i32_1 = arith.constant 0 : i32
    %c0_i32_2 = arith.constant 0 : i32
    return %c0_i32, %c0_i32_0, %c0_i32_1 : i32, i32, i32
  }
  func.func @transform_5(%arg0: i32) -> (i32, i32) {
    %c0_i32 = arith.constant 0 : i32
    %c0_i32_0 = arith.constant 0 : i32
    %c0_i32_1 = arith.constant 0 : i32
    return %c0_i32, %c0_i32_0 : i32, i32
  }
  func.func @transform_6(%arg0: i32) -> (i32, i32, i32) {
    %c0_i32 = arith.constant 0 : i32
    %c0_i32_0 = arith.constant 0 : i32
    %c0_i32_1 = arith.constant 0 : i32
    return %arg0, %c0_i32, %c0_i32_0 : i32, i32, i32
  }
}

</mosaic_0001>

<bundles_post_ra>
// kernel: eegnet_forward.1
= control target key start
LH: loop header
LB: loop body
LE: loop exit
PB: predicated region body
PF: predicated region fallthrough
CT: control target
= control target key end

     0   :  { %11 = vsyncpa [#allocation3], 0  ;;  %s4639_s0 = inlined_call_operand.vmem [shape: bf16[2,102,768], index: 0, kind: input, shape index: {}]   ;;  %s4640_s1 = inlined_call_operand.vmem [shape: bf16[32,103], index: 1, kind: input, shape index: {}]   ;;  %s4641_s2 = inlined_call_operand.vmem [shape: bf16[768,256], index: 2, kind: input, shape index: {}]   ;;  %s4642_s3 = inlined_call_operand.vmem [shape: f32[32,481], index: 3, kind: input, shape index: {}]   ;;  %s4643_s4 = inlined_call_operand.vmem [shape: f32[2,32,256], index: 4, kind: input, shape index: {}]   ;;  %s4644_s5 = inlined_call_operand.vmem [shape: f32[1,2], index: 5, kind: input, shape index: {}]   ;;  %s4645_s6 = inlined_call_operand.hbm [shape: f32[2,1,2], index: 6, kind: output, shape index: {}]  }
   0x1   :  { %13 = vsyncpa [#allocation3 + $0x1], 0  ;;  %s3078_s21 = smov 0   ;;  %s3080_s22 = smov 0  }
   0x2   :  { %s3082_s23 = smov 0   ;;  %s3084_s24 = smov 0  }
   0x3 LB: > { %s3099_s25 = sadd.s32 4294967295, %s3023_s24   ;;  %s2426_s26 = sadd.s32 4294967294, %s3023_s24   ;;  %s3023_s24 = sphi %s3084_s24, %s4758_s24   ;;  %s3019_s23 = sphi %s3082_s23, %s4757_s23   ;;  %s3015_s22 = sphi %s3080_s22, %s4756_s22   ;;  %s3011_s21 = sphi %s3078_s21, %s4755_s21  }
   0x4   : > { %s3103_s27 = sadd.s32 1, %s3023_s24   ;;  %s157_s28 = sadd.s32 1, %s3019_s23 }
   0x5   : > { %s154_s29 = ssub.s32 %s3023_s24, %s3103_s27  ;;  %p167_p0 = scmp.ne.s32.totalorder %s3019_s23, %s3015_s22 }
   0x6   : > { %p155_p1 = scmp.eq.s32.totalorder %s154_s29, 0  ;;  %p168_p2 = scmp.eq.s32.totalorder %s3099_s25, 1 }
   0x7   : > { %p173_p3 = scmp.ne.s32.totalorder %s3015_s22, %s3011_s21  ;;  %p174_p4 = scmp.eq.s32.totalorder %s2426_s26, 1 }
   0x8   : > { %s3114_s30 = scalar_select %p155_p1, %s3019_s23, %s157_s28  }
   0x9   : > { %p3116_p5 = por %p168_p2, %p167_p0  ;;  %p3120_p6 = por %p174_p4, %p173_p3 }
   0xa   : > { %p2429_p7 = scmp.ge.s32.totalorder %s3023_s24, 1  ;;  %p215_p8 = scmp.lt.s32.totalorder %s3023_s24, 3 }
   0xc   : > { %p216_p9 = pnand %p2429_p7, %p215_p8 }
   0xe   : > { %219 = sbr.rel (%p216_p9) target bundleno = 1542 (0x606), region = 44 }
  0x13   : > { %p244_p10 = scmp.lt.s32.totalorder %s3099_s25, 1  ;;  %v3130_v0 = vld [vmem:[%s4640_s1] sm:$0xff]   ;;  %v4647_v1 = vmov 0   ;;  %v3026_v3 = vmov 102   ;;  %v3140_v5 = vld [vmem:[%s4640_s1 + $0x8] sm:$0xff]   ;;  %vm529_vm0 = vcmask 1042432  }
  0x14   : > { %580 = vmatprep.mubr.bf16.mxu0 %v4647_v1  ;;  %633 = vmatprep.mubr.bf16.mxu1 %v4647_v1  ;;  %v293_v2 = vunpack.c.l.bf16 %v3130_v0  ;;  %v294_v4 = vunpack.c.h.bf16 %v3130_v0  ;;  %v295_v7 = vunpack.c.l.bf16 %v3140_v5  ;;  %v296_v8 = vunpack.c.h.bf16 %v3140_v5  ;;  %v2755_v45 = vld [vmem:[%s4641_s2 + $0x74] ss:$8 sps:$4 sm:$0xff]   ;;  %v2753_v48 = vld [vmem:[%s4641_s2 + $0x70] ss:$8 sps:$4 sm:$0xff]   ;;  %v2761_v49 = vld [vmem:[%s4641_s2 + $0x64] ss:$8 sps:$4 sm:$0xff]  }
  0x15   : > { %s245_s11 = scalar_select %p244_p10, %s3099_s25, 1  ;;  %2677 = vset.pattern.permute.xlu0 %v3026_v3  ;;  %vm522_vm1 = vcmask 834560   ;;  %v2759_v52 = vld [vmem:[%s4641_s2 + $0x60] ss:$8 sps:$4 sm:$0xff]   ;;  %v2767_v55 = vld [vmem:[%s4641_s2 + $0x54] ss:$8 sps:$4 sm:$0xff]  }
  0x16   : > { %v2678_v6 = vpack.i.bf16 %v294_v4, %v293_v2  ;;  %v2683_v17 = vpack.i.bf16 %v296_v8, %v295_v7  ;;  %v2765_v57 = vld [vmem:[%s4641_s2 + $0x50] ss:$8 sps:$4 sm:$0xff]   ;;  %v2773_v59 = vld [vmem:[%s4641_s2 + $0x44] ss:$8 sps:$4 sm:$0xff]   ;;  %v2771_v60 = vld [vmem:[%s4641_s2 + $0x40] ss:$8 sps:$4 sm:$0xff]  }
  0x17   : > { %s2620_s12 = smul.u32 312, %s245_s11  ;;  %v2779_v61 = vld [vmem:[%s4641_s2 + $0x34] ss:$8 sps:$4 sm:$0xff]   ;;  %v2777_v2 = vld [vmem:[%s4641_s2 + $0x30] ss:$8 sps:$4 sm:$0xff]   ;;  %s3027_s16 = smov 4  }
  0x18   : > { %2679 = vperm.xlu0 %2677, %v2678_v6   ;;  %v2785_v3 = vld [vmem:[%s4641_s2 + $0x24] ss:$8 sps:$4 sm:$0xff]   ;;  %v2783_v7 = vld [vmem:[%s4641_s2 + $0x20] ss:$8 sps:$4 sm:$0xff]   ;;  %v2791_v8 = vld [vmem:[%s4641_s2 + $0x14] ss:$8 sps:$4 sm:$0xff]  }
  0x19   : > { %s3147_s17 = scalar_lea.vmem %s4639_s0, %s2620_s12  ;;  %s3028_s18 = smov 5  }
  0x1a   : > { %v290_v9 = vld [vmem:[%s3147_s17 + $0x120] sm:$0x77]  ;;  %v291_v10 = vld [vmem:[%s3147_s17 + $0x128] sm:$0x77]  ;;  %v2697_v16 = vld [vmem:[%s3147_s17 + $0xfc] ss:$24 sps:$4 sm:$0xff]  }
  0x1b   : > { %v2470_v11 = vcombine.high %v290_v9, %v290_v9  ;;  %v2472_v12 = vcombine.high %v291_v10, %v291_v10  ;;  %v2469_v13 = vcombine.low %v290_v9, %v290_v9  ;;  %v2471_v14 = vcombine.low %v291_v10, %v291_v10  ;;  %v2695_v15 = vld [vmem:[%s3147_s17 + $0xf4] ss:$24 sps:$4 sm:$0xff]   ;;  %v2699_v20 = vld [vmem:[%s3147_s17 + $0xf0] ss:$24 sps:$4 sm:$0xff]   ;;  %v2701_v22 = vld [vmem:[%s3147_s17 + $0xc4] ss:$24 sps:$4 sm:$0xff]  }
  0x1c   : > { %v2700_v21 = vld [vmem:[%s3147_s17 + $0xf8] ss:$24 sps:$4 sm:$0xff]   ;;  %v2703_v23 = vld [vmem:[%s3147_s17 + $0xcc] ss:$24 sps:$4 sm:$0xff]   ;;  %2684 = vperm.xlu0 %2677, %v2683_v17   ;;  %v2706_v25 = vld [vmem:[%s3147_s17 + $0xc8] ss:$24 sps:$4 sm:$0xff]  }
  0x1d   : > { %2475 = vmatprep.subr.msk.bf16.mxu0 %vm529_vm0, %v2470_v11  ;;  %2478 = vmatprep.subr.msk.bf16.mxu1 %vm529_vm0, %v2472_v12  ;;  %v531_v18 = vsel %vm529_vm0, %v2469_v13, 0  ;;  %v537_v19 = vsel %vm529_vm0, %v2471_v14, 0  ;;  %v2705_v24 = vld [vmem:[%s3147_s17 + $0xc0] ss:$24 sps:$4 sm:$0xff]   ;;  %v2707_v26 = vld [vmem:[%s3147_s17 + $0x94] ss:$24 sps:$4 sm:$0xff]  }
  0x1e   : > { %551 = vmatpush1.bf16.msra.mxu0 %v531_v18  ;;  %604 = vmatpush1.bf16.msra.mxu1 %v537_v19  ;;  %v2709_v27 = vld [vmem:[%s3147_s17 + $0x9c] ss:$24 sps:$4 sm:$0xff]   ;;  %v2711_v28 = vld [vmem:[%s3147_s17 + $0x90] ss:$24 sps:$4 sm:$0xff]   ;;  %v2715_v31 = vld [vmem:[%s3147_s17 + $0x6c] ss:$24 sps:$4 sm:$0xff]  }
  0x1f   : > { %552 = vmatprep.subr.bf16.mxu0 %v2695_v15  ;;  %605 = vmatprep.subr.bf16.mxu1 %v2697_v16  ;;  %v2712_v29 = vld [vmem:[%s3147_s17 + $0x98] ss:$24 sps:$4 sm:$0xff]   ;;  %v2713_v30 = vld [vmem:[%s3147_s17 + $0x64] ss:$24 sps:$4 sm:$0xff]   ;;  %v2718_v33 = vld [vmem:[%s3147_s17 + $0x68] ss:$24 sps:$4 sm:$0xff]  }
  0x20   : > { %v2717_v32 = vld [vmem:[%s3147_s17 + $0x60] ss:$24 sps:$4 sm:$0xff]   ;;  %v2719_v34 = vld [vmem:[%s3147_s17 + $0x34] ss:$24 sps:$4 sm:$0xff]   ;;  %v2723_v36 = vld [vmem:[%s3147_s17 + $0x30] ss:$24 sps:$4 sm:$0xff]  }
  0x21   : > { %v2721_v35 = vld [vmem:[%s3147_s17 + $0x3c] ss:$24 sps:$4 sm:$0xff]   ;;  %v2724_v37 = vld [vmem:[%s3147_s17 + $0x38] ss:$24 sps:$4 sm:$0xff]   ;;  %v2727_v39 = vld [vmem:[%s3147_s17 + $0xc] ss:$24 sps:$4 sm:$0xff]  }
  0x22   : > { %553 = vmatpush1.bf16.msra.mxu0 %v2699_v20  ;;  %606 = vmatpush1.bf16.msra.mxu1 %v2700_v21  ;;  %v2725_v38 = vld [vmem:[%s3147_s17 + $0x4] ss:$24 sps:$4 sm:$0xff]   ;;  %v292_v40 = vld [vmem:[%s3147_s17 + $0x130] sm:$0x77]  ;;  %v2729_v41 = vld [vmem:[%s3147_s17] ss:$24 sps:$4 sm:$0xff]  }
  0x23   : > { %554 = vmatprep.subr.bf16.mxu0 %v2701_v22  ;;  %607 = vmatprep.subr.bf16.mxu1 %v2703_v23  ;;  %v2730_v42 = vld [vmem:[%s3147_s17 + $0x8] ss:$24 sps:$4 sm:$0xff]   ;;  %v2474_v43 = vcombine.high %v292_v40, %v292_v40  ;;  %v2473_v44 = vcombine.low %v292_v40, %v292_v40  ;;  %v2736_v47 = vld [vmem:[%s3147_s17 + $0x104] ss:$24 sps:$4 sm:$0xff]   ;;  %v2740_v51 = vld [vmem:[%s3147_s17 + $0xd4] ss:$24 sps:$4 sm:$0xff]  }
  0x24   : > { %v2734_v50 = vld [vmem:[%s3147_s17 + $0x100] ss:$24 sps:$4 sm:$0xff]   ;;  %v2738_v53 = vld [vmem:[%s3147_s17 + $0xd0] ss:$24 sps:$4 sm:$0xff]   ;;  %v2743_v54 = vld [vmem:[%s3147_s17 + $0xa4] ss:$24 sps:$4 sm:$0xff]  }
  0x25   : > { %v543_v46 = vsel %vm529_vm0, %v2473_v44, 0  ;;  %v2741_v56 = vld [vmem:[%s3147_s17 + $0xa0] ss:$24 sps:$4 sm:$0xff]   ;;  %v2746_v58 = vld [vmem:[%s3147_s17 + $0x74] ss:$24 sps:$4 sm:$0xff]   ;;  %s3029_s19 = smov 124  }
  0x26   : > { %555 = vmatpush1.bf16.msra.mxu0 %v2705_v24  ;;  %608 = vmatpush1.bf16.msra.mxu1 %v2706_v25  ;;  %v2744_v62 = vld [vmem:[%s3147_s17 + $0x70] ss:$24 sps:$4 sm:$0xff]   ;;  %v2749_v63 = vld [vmem:[%s3147_s17 + $0x44] ss:$24 sps:$4 sm:$0xff]   ;;  %v2747_v4 = vld [vmem:[%s3147_s17 + $0x40] ss:$24 sps:$4 sm:$0xff]  }
  0x27   : > { %556 = vmatprep.subr.bf16.mxu0 %v2707_v26  ;;  %609 = vmatprep.subr.bf16.mxu1 %v2709_v27  ;;  %v2752_v6 = vld [vmem:[%s3147_s17 + $0x14] ss:$24 sps:$4 sm:$0xff]   ;;  %v2750_v9 = vld [vmem:[%s3147_s17 + $0x10] ss:$24 sps:$4 sm:$0xff]   ;;  %s3030_s20 = smov 6   ;;  %s3031_s26 = smov 125  }
  0x28   : > { %v2758_v10 = vld [vmem:[%s4641_s2 + $0x174] ss:$8 sps:$4 sm:$0xff]   ;;  %v2789_v11 = vld [vmem:[%s4641_s2 + $0x10] ss:$8 sps:$4 sm:$0xff]   ;;  %v2797_v12 = vld [vmem:[%s4641_s2 + $0x4] ss:$8 sps:$4 sm:$0xff]  }
  0x29   : > { %v2756_v13 = vld [vmem:[%s4641_s2 + $0x170] ss:$8 sps:$4 sm:$0xff]   ;;  %v2764_v14 = vld [vmem:[%s4641_s2 + $0x164] ss:$8 sps:$4 sm:$0xff]   ;;  %v2795_v15 = vld [vmem:[%s4641_s2] ss:$8 sps:$4 sm:$0xff]  }
  0x2a   : > { %557 = vmatpush1.bf16.msra.mxu0 %v2711_v28  ;;  %610 = vmatpush1.bf16.msra.mxu1 %v2712_v29  ;;  %v2762_v16 = vld [vmem:[%s4641_s2 + $0x160] ss:$8 sps:$4 sm:$0xff]   ;;  %v2770_v17 = vld [vmem:[%s4641_s2 + $0x154] ss:$8 sps:$4 sm:$0xff]   ;;  %v2768_v18 = vld [vmem:[%s4641_s2 + $0x150] ss:$8 sps:$4 sm:$0xff]  }
  0x2b   : > { %558 = vmatprep.subr.bf16.mxu0 %v2713_v30  ;;  %611 = vmatprep.subr.bf16.mxu1 %v2715_v31  ;;  %v2774_v19 = vld [vmem:[%s4641_s2 + $0x140] ss:$8 sps:$4 sm:$0xff]   ;;  %v2782_v20 = vld [vmem:[%s4641_s2 + $0x134] ss:$8 sps:$4 sm:$0xff]   ;;  %v2780_v21 = vld [vmem:[%s4641_s2 + $0x130] ss:$8 sps:$4 sm:$0xff]  }
  0x2c   : > { %v2786_v22 = vld [vmem:[%s4641_s2 + $0x120] ss:$8 sps:$4 sm:$0xff]   ;;  %v2794_v23 = vld [vmem:[%s4641_s2 + $0x114] ss:$8 sps:$4 sm:$0xff]   ;;  %v2792_v24 = vld [vmem:[%s4641_s2 + $0x110] ss:$8 sps:$4 sm:$0xff]  }
  0x2d   : > { %v2800_v25 = vld [vmem:[%s4641_s2 + $0x104] ss:$8 sps:$4 sm:$0xff]   ;;  %v2798_v26 = vld [vmem:[%s4641_s2 + $0x100] ss:$8 sps:$4 sm:$0xff]   ;;  %v2803_v27 = vld [vmem:[%s4641_s2 + $0xf4] ss:$8 sps:$4 sm:$0xff]  }
  0x2e   : > { %559 = vmatpush1.bf16.msra.mxu0 %v2717_v32  ;;  %612 = vmatpush1.bf16.msra.mxu1 %v2718_v33  ;;  %v2801_v28 = vld [vmem:[%s4641_s2 + $0xf0] ss:$8 sps:$4 sm:$0xff]   ;;  %v2806_v29 = vld [vmem:[%s4641_s2 + $0x1f4] ss:$8 sps:$4 sm:$0xff]   ;;  %v2809_v31 = vld [vmem:[%s4641_s2 + $0xe4] ss:$8 sps:$4 sm:$0xff]  }
  0x2f   : > { %560 = vmatprep.subr.bf16.mxu0 %v2719_v34  ;;  %613 = vmatprep.subr.bf16.mxu1 %v2721_v35  ;;  %v2804_v30 = vld [vmem:[%s4641_s2 + $0x1f0] ss:$8 sps:$4 sm:$0xff]   ;;  %v2807_v32 = vld [vmem:[%s4641_s2 + $0xe0] ss:$8 sps:$4 sm:$0xff]   ;;  %v2812_v33 = vld [vmem:[%s4641_s2 + $0x1e4] ss:$8 sps:$4 sm:$0xff]  }
  0x30   : > { %v2810_v34 = vld [vmem:[%s4641_s2 + $0x1e0] ss:$8 sps:$4 sm:$0xff]   ;;  %v2815_v35 = vld [vmem:[%s4641_s2 + $0xd4] ss:$8 sps:$4 sm:$0xff]   ;;  %v2825_v44 = vld [vmem:[%s4641_s2 + $0xb0] ss:$8 sps:$4 sm:$0xff]  }
  0x31   : > { %v2819_v40 = vld [vmem:[%s4641_s2 + $0xc0] ss:$8 sps:$4 sm:$0xff]   ;;  %s3032_s28 = smov 7   ;;  %s3033_s29 = smov 126  }
  0x32   : > { %561 = vmatpush1.bf16.msra.mxu0 %v2723_v36  ;;  %614 = vmatpush1.bf16.msra.mxu1 %v2724_v37  ;;  %v2813_v36 = vld [vmem:[%s4641_s2 + $0xd0] ss:$8 sps:$4 sm:$0xff]   ;;  %v2818_v37 = vld [vmem:[%s4641_s2 + $0x1d4] ss:$8 sps:$4 sm:$0xff]   ;;  %s3034_s17 = smov 127   ;;  %s3035_s9 = smov 1  }
  0x33   : > { %562 = vmatprep.subr.bf16.mxu0 %v2725_v38  ;;  %615 = vmatprep.subr.bf16.mxu1 %v2727_v39  ;;  %v2816_v38 = vld [vmem:[%s4641_s2 + $0x1d0] ss:$8 sps:$4 sm:$0xff]   ;;  %v2821_v39 = vld [vmem:[%s4641_s2 + $0xc4] ss:$8 sps:$4 sm:$0xff]   ;;  %s3036_s10 = smov 121   ;;  %s3037_s11 = smov 2  }
  0x34   : > { %s3038_s12 = smov 122   ;;  %s3039_s13 = smov 3  }
  0x35   : > { %s3040_s14 = smov 123   ;;  %s3042_s15 = smov [#allocation2]  }
  0x36   : > { %563 = vmatpush1.bf16.msra.mxu0 %v2729_v41  ;;  %616 = vmatpush1.bf16.msra.mxu1 %v2730_v42  ;;  %v2824_v41 = vld [vmem:[%s4641_s2 + $0x1c4] ss:$8 sps:$4 sm:$0xff]   ;;  %v2822_v42 = vld [vmem:[%s4641_s2 + $0x1c0] ss:$8 sps:$4 sm:$0xff]  }
  0x37   : > { %2481 = vmatprep.subr.msk.bf16.mxu0 %vm529_vm0, %v2474_v43  ;;  %1439 = vmatprep.subr.bf16.mxu1 %v2755_v45  ;;  %v2827_v43 = vld [vmem:[%s4641_s2 + $0xb4] ss:$8 sps:$4 sm:$0xff]  }
  0x38   : > { %v2830_v45 = vld [vmem:[%s4641_s2 + $0x1b4] ss:$8 sps:$4 sm:$0xff]  }
  0x39   : > { %2476 = vmatmul.mubr.msk.bf16.vlgmr.msra.gmra.mxu0 %vm522_vm1, %v3130_v0  ;;  %2479 = vmatmul.mubr.msk.bf16.vlgmr.msra.gmra.mxu1 %vm522_vm1, %v3130_v0 }
  0x3a   : > { %657 = vmatpush1.bf16.msra.mxu0 %v543_v46  ;;  %590 = vmatprep.mubr.bf16.mxu0 %v4647_v1  ;;  %v2828_v46 = vld [vmem:[%s4641_s2 + $0x1b0] ss:$8 sps:$4 sm:$0xff]  }
  0x3b   : > { %658 = vmatprep.subr.bf16.mxu0 %v2736_v47  ;;  %643 = vmatprep.mubr.bf16.mxu1 %v4647_v1  ;;  %v2833_v47 = vld [vmem:[%s4641_s2 + $0xa4] ss:$8 sps:$4 sm:$0xff]  }
  0x3c   : > { %1440 = vmatpush1.bf16.msra.mxu1 %v2753_v48  ;;  %v2831_v48 = vld [vmem:[%s4641_s2 + $0xa0] ss:$8 sps:$4 sm:$0xff]  }
  0x3d   : > { %1441 = vmatprep.subr.bf16.mxu1 %v2761_v49  ;;  %v2836_v49 = vld [vmem:[%s4641_s2 + $0x1a4] ss:$8 sps:$4 sm:$0xff]  }
  0x3e   : > { %659 = vmatpush1.bf16.msra.mxu0 %v2734_v50  ;;  %v2834_v50 = vld [vmem:[%s4641_s2 + $0x1a0] ss:$8 sps:$4 sm:$0xff]  }
  0x3f   : > { %660 = vmatprep.subr.bf16.mxu0 %v2740_v51  ;;  %v2839_v51 = vld [vmem:[%s4641_s2 + $0x94] ss:$8 sps:$4 sm:$0xff]  }
  0x40   : > { %1442 = vmatpush1.bf16.msra.mxu1 %v2759_v52  ;;  %v2837_v52 = vld [vmem:[%s4641_s2 + $0x90] ss:$8 sps:$4 sm:$0xff]  }
  0x41   : > { %2477 = vmatmul.mubr.msk.bf16.gmra.mxu0 %vm522_vm1, %v3140_v5  ;;  %2480 = vmatmul.mubr.msk.bf16.gmra.mxu1 %vm522_vm1, %v3140_v5 }
  0x42   : > { %661 = vmatpush1.bf16.msra.mxu0 %v2738_v53  ;;  %686 = vmatprep.mubr.bf16.mxu0 %v4647_v1  ;;  %v2842_v53 = vld [vmem:[%s4641_s2 + $0x194] ss:$8 sps:$4 sm:$0xff]  }
  0x43   : > { %662 = vmatprep.subr.bf16.mxu0 %v2743_v54  ;;  %1443 = vmatprep.subr.bf16.mxu1 %v2767_v55  ;;  %v2840_v54 = vld [vmem:[%s4641_s2 + $0x190] ss:$8 sps:$4 sm:$0xff]   ;;  %v2845_v55 = vld [vmem:[%s4641_s2 + $0x84] ss:$8 sps:$4 sm:$0xff]  }
  0x44   : > { %1444 = vmatpush1.bf16.msra.mxu1 %v2765_v57  ;;  %v2848_v57 = vld [vmem:[%s4641_s2 + $0x184] ss:$8 sps:$4 sm:$0xff]  }
  0x45   : > { %1445 = vmatprep.subr.bf16.mxu1 %v2773_v59  ;;  %v2851_v59 = vld [vmem:[%s4641_s2 + $0x274] ss:$8 sps:$4 sm:$0xff]  }
  0x46   : > { %663 = vmatpush1.bf16.msra.mxu0 %v2741_v56  ;;  %v2843_v56 = vld [vmem:[%s4641_s2 + $0x80] ss:$8 sps:$4 sm:$0xff]  }
  0x47   : > { %664 = vmatprep.subr.bf16.mxu0 %v2746_v58  ;;  %v2846_v58 = vld [vmem:[%s4641_s2 + $0x180] ss:$8 sps:$4 sm:$0xff]  }
  0x48   : > { %1446 = vmatpush1.bf16.msra.mxu1 %v2771_v60 }
  0x49   : > { %1447 = vmatprep.subr.bf16.mxu1 %v2779_v61 }
  0x4a   : > { %665 = vmatpush1.bf16.msra.mxu0 %v2744_v62 }
  0x4b   : > { %666 = vmatprep.subr.bf16.mxu0 %v2749_v63 }
  0x4c   : > { %1448 = vmatpush1.bf16.msra.mxu1 %v2777_v2 }
  0x4d   : > { %1449 = vmatprep.subr.bf16.mxu1 %v2785_v3 }
  0x4e   : > { %667 = vmatpush1.bf16.msra.mxu0 %v2747_v4 }
  0x4f   : > { %668 = vmatprep.subr.bf16.mxu0 %v2752_v6 }
  0x50   : > { %1450 = vmatpush1.bf16.msra.mxu1 %v2783_v7 }
  0x51   : > { %1451 = vmatprep.subr.bf16.mxu1 %v2791_v8 }
  0x52   : > { %669 = vmatpush1.bf16.msra.mxu0 %v2750_v9 }
  0x53   : > { %1492 = vmatprep.subr.bf16.mxu0 %v2758_v10 }
  0x54   : > { %1452 = vmatpush1.bf16.msra.mxu1 %v2789_v11 }
  0x55   : > { %2482 = vmatmul.mubr.msk.bf16.vlgmr.msra.gmra.mxu0 %vm522_vm1, %v3130_v0  ;;  %1453 = vmatprep.subr.bf16.mxu1 %v2797_v12  ;;  %v2776_v0 = vld [vmem:[%s4641_s2 + $0x144] ss:$8 sps:$4 sm:$0xff]  }
  0x56   : > { %696 = vmatprep.mubr.bf16.mxu0 %v4647_v1  ;;  %1493 = vmatpush1.bf16.msra.mxu0 %v2756_v13  ;;  %v1953_v1 = vld [vmem:[%s4642_s3 + $0x18] sm:$0xff] }
  0x57   : > { %1494 = vmatprep.subr.bf16.mxu0 %v2764_v14 }
  0x58   : > { %1454 = vmatpush1.bf16.msra.mxu1 %v2795_v15 }
  0x59   : > { %1455 = vmatprep.subr.bf16.mxu1 %v2803_v27 }
  0x5a   : > { %1495 = vmatpush1.bf16.msra.mxu0 %v2762_v16 }
  0x5b   : > { %1496 = vmatprep.subr.bf16.mxu0 %v2770_v17 }
  0x5c   : > { %1456 = vmatpush2.bf16.msra.mxu1 %v2801_v28 }
  0x5d   : > { %2483 = vmatmul.mubr.msk.bf16.gmra.mxu0 %vm522_vm1, %v3140_v5  ;;  %v2788_v5 = vld [vmem:[%s4641_s2 + $0x124] ss:$8 sps:$4 sm:$0xff]   ;;  %1457 = vmatprep.subr.bf16.mxu1 %v2809_v31 }
  0x5e   : > { %1497 = vmatpush1.bf16.msra.mxu0 %v2768_v18 }
  0x5f   : > { %1498 = vmatprep.subr.bf16.mxu0 %v2776_v0 }
  0x60   : > { %1458 = vmatpush2.bf16.msra.mxu1 %v2807_v32 }
  0x61   : > { %1459 = vmatprep.subr.bf16.mxu1 %v2815_v35 }
  0x62   : > { %1499 = vmatpush1.bf16.msra.mxu0 %v2774_v19 }
  0x63   : > { %1500 = vmatprep.subr.bf16.mxu0 %v2782_v20 }
  0x64   : > { %1460 = vmatpush2.bf16.msra.mxu1 %v2813_v36 }
  0x65   : > { %1461 = vmatprep.subr.bf16.mxu1 %v2821_v39 }
  0x66   : > { %1501 = vmatpush1.bf16.msra.mxu0 %v2780_v21 }
  0x67   : > { %1502 = vmatprep.subr.bf16.mxu0 %v2788_v5 }
  0x68   : > { %1462 = vmatpush2.bf16.msra.mxu1 %v2819_v40 }
  0x69   : > { %1463 = vmatprep.subr.bf16.mxu1 %v2827_v43 }
  0x6a   : > { %1503 = vmatpush1.bf16.msra.mxu0 %v2786_v22 }
  0x6b   : > { %1504 = vmatprep.subr.bf16.mxu0 %v2794_v23 }
  0x6c   : > { %1464 = vmatpush2.bf16.msra.mxu1 %v2825_v44 }
  0x6d   : > { %1465 = vmatprep.subr.bf16.mxu1 %v2833_v47 }
  0x6e   : > { %1505 = vmatpush1.bf16.msra.mxu0 %v2792_v24 }
  0x6f   : > { %1506 = vmatprep.subr.bf16.mxu0 %v2800_v25 }
  0x70   : > { %1466 = vmatpush2.bf16.msra.mxu1 %v2831_v48 }
  0x71   : > { %1467 = vmatprep.subr.bf16.mxu1 %v2839_v51 }
  0x72   : > { %1507 = vmatpush1.bf16.msra.mxu0 %v2798_v26 }
  0x73   : > { %1508 = vmatprep.subr.bf16.mxu0 %v2806_v29 }
  0x74   : > { %1468 = vmatpush2.bf16.msra.mxu1 %v2837_v52 }
  0x75   : > { %1469 = vmatprep.subr.bf16.mxu1 %v2845_v55 }
  0x76   : > { %1509 = vmatpush2.bf16.msra.mxu0 %v2804_v30 }
  0x77   : > { %1510 = vmatprep.subr.bf16.mxu0 %v2812_v33 }
  0x78   : > { %1470 = vmatpush2.bf16.msra.mxu1 %v2843_v56 }
  0x79   : > { %1545 = vmatprep.subr.bf16.mxu1 %v2851_v59 }
  0x7a   : > { %1511 = vmatpush2.bf16.msra.mxu0 %v2810_v34 }
  0x7b   : > { %1512 = vmatprep.subr.bf16.mxu0 %v2818_v37 }
  0x7e   : > { %1513 = vmatpush2.bf16.msra.mxu0 %v2816_v38 }
  0x7f   : > { %1514 = vmatprep.subr.bf16.mxu0 %v2824_v41 }
  0x82   : > { %1515 = vmatpush2.bf16.msra.mxu0 %v2822_v42 }
  0x83   : > { %1516 = vmatprep.subr.bf16.mxu0 %v2830_v45 }
  0x86   : > { %1517 = vmatpush2.bf16.msra.mxu0 %v2828_v46 }
  0x87   : > { %1518 = vmatprep.subr.bf16.mxu0 %v2836_v49 }
  0x8a   : > { %1519 = vmatpush2.bf16.msra.mxu0 %v2834_v50 }
  0x8b   : > { %1520 = vmatprep.subr.bf16.mxu0 %v2842_v53 }
  0x8e   : > { %1521 = vmatpush2.bf16.msra.mxu0 %v2840_v54 }
  0x8f   : > { %1522 = vmatprep.subr.bf16.mxu0 %v2848_v57 }
  0x92   : > { %1523 = vmatpush2.bf16.msra.mxu0 %v2846_v58 }
  0x93   : > { %v2680_v60 = vpop.permute.xlu0 %2679 }
  0x94   : > { %v3405_v61 = vunpack.i.l.bf16 %v2680_v60  ;;  %v3407_v2 = vunpack.i.h.bf16 %v2680_v60 }
  0x97   : > { %v2685_v10 = vpop.permute.xlu0 %2684 }
  0x98   : > { %v3431_v5 = vunpack.i.l.bf16 %v2685_v10  ;;  %v3450_v41 = vunpack.i.h.bf16 %v2685_v10 }
  0xf9   : > { %v582_v62 = vpop.f32.mrf.mxu0  ;;  %v635_v63 = vpop.f32.mrf.mxu1 }
  0xfa   : > { %v3410_v3 = vadd.f32 %v3405_v61, %v582_v62  ;;  %v3413_v4 = vadd.f32 %v3405_v61, %v635_v63 }
  0xfb   : > { %v584_v6 = vpop.f32.mrf.mxu0  ;;  %v637_v7 = vpop.f32.mrf.mxu1 }
  0xfc   : > { %v731_v8 = vmin.f32 %v3410_v3, 0.0  ;;  %v733_v9 = vmin.f32 %v3413_v4, 0.0  ;;  %v3418_v11 = vadd.f32 %v3405_v61, %v584_v6  ;;  %v3421_v12 = vadd.f32 %v3405_v61, %v637_v7 }
  0xfd   : > { %v586_v13 = vpop.f32.mrf.mxu0  ;;  %v639_v14 = vpop.f32.mrf.mxu1  ;;  %vm707_vm2 = vcmp.gt.f32.partialorder %v3410_v3, 0.0  ;;  %vm709_vm3 = vcmp.gt.f32.partialorder %v3413_v4, 0.0 }
  0xfe   : > { %v755_v15 = vmul.f32 1.442695, %v731_v8  ;;  %v759_v16 = vmul.f32 1.442695, %v733_v9  ;;  %v3424_v17 = vadd.f32 %v3407_v2, %v586_v13  ;;  %v3427_v18 = vadd.f32 %v3407_v2, %v639_v14 }
  0xff   : > { %v732_v0 = vmin.f32 %v3418_v11, 0.0  ;;  %v734_v19 = vmin.f32 %v3421_v12, 0.0  ;;  %v588_v20 = vpop.f32.mrf.mxu0  ;;  %v641_v21 = vpop.f32.mrf.mxu1  ;;  %vm708_vm4 = vcmp.gt.f32.partialorder %v3418_v11, 0.0  ;;  %vm710_vm5 = vcmp.gt.f32.partialorder %v3421_v12, 0.0 }
 0x100   : > { %2899 = vpow2.f32 %v755_v15  ;;  %v737_v22 = vmin.f32 %v3424_v17, 0.0  ;;  %v739_v25 = vmin.f32 %v3427_v18, 0.0  ;;  %v3436_v29 = vadd.f32 %v3407_v2, %v588_v20 }
 0x101   : > { %2901 = vpow2.f32 %v759_v16  ;;  %v757_v23 = vmul.f32 1.442695, %v732_v0  ;;  %v761_v24 = vmul.f32 1.442695, %v734_v19  ;;  %v592_v26 = vpop.f32.mrf.mxu0  ;;  %v645_v27 = vpop.f32.mrf.mxu1  ;;  %v3439_v30 = vadd.f32 %v3407_v2, %v641_v21 }
 0x102   : > { %v767_v28 = vmul.f32 1.442695, %v737_v22  ;;  %v3442_v31 = vadd.f32 %v3431_v5, %v592_v26  ;;  %v771_v32 = vmul.f32 1.442695, %v739_v25  ;;  %v738_v35 = vmin.f32 %v3436_v29, 0.0 }
 0x103   : > { %2903 = vpow2.f32 %v757_v23  ;;  %v594_v33 = vpop.f32.mrf.mxu0  ;;  %v647_v34 = vpop.f32.mrf.mxu1  ;;  %v740_v36 = vmin.f32 %v3439_v30, 0.0  ;;  %v3448_v38 = vadd.f32 %v3431_v5, %v645_v27  ;;  %vm713_vm6 = vcmp.gt.f32.partialorder %v3424_v17, 0.0 }
 0x104   : > { %2905 = vpow2.f32 %v761_v24  ;;  %v743_v37 = vmin.f32 %v3442_v31, 0.0  ;;  %v769_v42 = vmul.f32 1.442695, %v738_v35  ;;  %v3453_v45 = vadd.f32 %v3431_v5, %v594_v33 }
 0x105   : > { %2907 = vpow2.f32 %v767_v28  ;;  %v596_v39 = vpop.f32.mrf.mxu0  ;;  %v649_v40 = vpop.f32.mrf.mxu1  ;;  %v773_v43 = vmul.f32 1.442695, %v740_v36  ;;  %v3456_v46 = vadd.f32 %v3431_v5, %v647_v34  ;;  %v745_v49 = vmin.f32 %v3448_v38, 0.0 }
 0x106   : > { %2909 = vpow2.f32 %v771_v32  ;;  %v779_v44 = vmul.f32 1.442695, %v743_v37  ;;  %v3459_v47 = vadd.f32 %v3450_v41, %v596_v39  ;;  %v3462_v48 = vadd.f32 %v3450_v41, %v649_v40 }
 0x107   : > { %2911 = vpow2.f32 %v769_v42  ;;  %v744_v50 = vmin.f32 %v3453_v45, 0.0  ;;  %v598_v51 = vpop.f32.mrf.mxu0  ;;  %v651_v52 = vpop.f32.mrf.mxu1  ;;  %v746_v53 = vmin.f32 %v3456_v46, 0.0  ;;  %v783_v63 = vmul.f32 1.442695, %v745_v49 }
 0x108   : > { %2913 = vpow2.f32 %v773_v43  ;;  %v749_v54 = vmin.f32 %v3459_v47, 0.0  ;;  %v751_v56 = vmin.f32 %v3462_v48, 0.0  ;;  %v3470_v59 = vadd.f32 %v3450_v41, %v598_v51 }
 0x109   : > { %2915 = vpow2.f32 %v779_v44  ;;  %v781_v55 = vmul.f32 1.442695, %v744_v50  ;;  %v785_v57 = vmul.f32 1.442695, %v746_v53  ;;  %v3473_v60 = vadd.f32 %v3450_v41, %v651_v52 }
 0x10a   : > { %v791_v58 = vmul.f32 1.442695, %v749_v54  ;;  %v795_v6 = vmul.f32 1.442695, %v751_v56  ;;  %v750_v8 = vmin.f32 %v3470_v59, 0.0  ;;  %vm715_vm7 = vcmp.gt.f32.partialorder %v3427_v18, 0.0 }
 0x10b   : > { %2917 = vpow2.f32 %v781_v55  ;;  %v752_v9 = vmin.f32 %v3473_v60, 0.0  ;;  %vm714_vm8 = vcmp.gt.f32.partialorder %v3436_v29, 0.0  ;;  %vm716_vm9 = vcmp.gt.f32.partialorder %v3439_v30, 0.0 }
 0x10c   : > { %2919 = vpow2.f32 %v785_v57  ;;  %v793_v13 = vmul.f32 1.442695, %v750_v8  ;;  %vm720_vm10 = vcmp.gt.f32.partialorder %v3453_v45, 0.0  ;;  %vm722_vm11 = vcmp.gt.f32.partialorder %v3456_v46, 0.0 }
 0x10d   : > { %v2900_v62 = vpop.eup %2899  ;;  %2921 = vpow2.f32 %v791_v58  ;;  %v797_v15 = vmul.f32 1.442695, %v752_v9  ;;  %vm725_vm12 = vcmp.gt.f32.partialorder %v3459_v47, 0.0  ;;  %vm727_vm13 = vcmp.gt.f32.partialorder %v3462_v48, 0.0 }
 0x10e   : > { %v2902_v7 = vpop.eup %2901  ;;  %2923 = vpow2.f32 %v795_v6  ;;  %v2484_v19 = vadd.f32 -1.0, %v2900_v62  ;;  %vm726_vm14 = vcmp.gt.f32.partialorder %v3470_v59, 0.0  ;;  %vm728_vm15 = vcmp.gt.f32.partialorder %v3473_v60, 0.0 }
 0x10f   : > { %2925 = vpow2.f32 %v783_v63  ;;  %v2486_v33 = vadd.f32 -1.0, %v2902_v7  ;;  %v2857_v7 = vld [vmem:[%s4641_s2 + $0x254] ss:$8 sps:$4 sm:$0xff]   ;;  %vm719_vm0 = vcmp.gt.f32.partialorder %v3442_v31, 0.0  ;;  %vm721_vm1 = vcmp.gt.f32.partialorder %v3448_v38, 0.0 }
 0x110   : > { %v2904_v10 = vpop.eup %2903  ;;  %2927 = vpow2.f32 %v793_v13  ;;  %v827_v32 = vsel %vm707_vm2, %v3410_v3, %v2484_v19  ;;  %v2855_v19 = vld [vmem:[%s4641_s2 + $0x250] ss:$8 sps:$4 sm:$0xff]  }
 0x111   : > { %v2906_v14 = vpop.eup %2905  ;;  %2929 = vpow2.f32 %v797_v15  ;;  %v2485_v21 = vadd.f32 -1.0, %v2904_v10 }
 0x112   : > { %v2908_v16 = vpop.eup %2907  ;;  %v2487_v25 = vadd.f32 -1.0, %v2906_v14 }
 0x113   : > { %v2910_v0 = vpop.eup %2909  ;;  %v2490_v20 = vadd.f32 -1.0, %v2908_v16  ;;  %v828_v42 = vsel %vm708_vm4, %v3418_v11, %v2485_v21  ;;  %v2849_v11 = vld [vmem:[%s4641_s2 + $0x270] ss:$8 sps:$4 sm:$0xff]  }
 0x114   : > { %v2912_v22 = vpop.eup %2911  ;;  %v2492_v23 = vadd.f32 -1.0, %v2910_v0  ;;  %v830_v49 = vsel %vm710_vm5, %v3421_v12, %v2487_v25  ;;  %v2854_v12 = vld [vmem:[%s4641_s2 + $0x264] ss:$8 sps:$4 sm:$0xff]  }
 0x115   : > { %v688_v24 = vpop.f32.mrf.mxu0  ;;  %v2914_v26 = vpop.eup %2913  ;;  %v2491_v28 = vadd.f32 -1.0, %v2912_v22  ;;  %v833_v34 = vsel %vm713_vm6, %v3424_v17, %v2490_v20 }
 0x116   : > { %v3486_v27 = vadd.f32 %v3405_v61, %v688_v24  ;;  %v2493_v36 = vadd.f32 -1.0, %v2914_v26  ;;  %v2916_v37 = vpop.eup %2915  ;;  %v835_v3 = vsel %vm715_vm7, %v3427_v18, %v2492_v23  ;;  %v2860_v26 = vld [vmem:[%s4641_s2 + $0x244] ss:$8 sps:$4 sm:$0xff]  }
 0x117   : > { %v690_v35 = vpop.f32.mrf.mxu0  ;;  %v834_v43 = vsel %vm714_vm8, %v3436_v29, %v2491_v28  ;;  %v851_v29 = vpack.c.bf16 %v833_v34, %v827_v32  ;;  %v2496_v20 = vadd.f32 -1.0, %v2916_v37 }
 0x118   : > { %v735_v39 = vmin.f32 %v3486_v27, 0.0  ;;  %v3494_v40 = vadd.f32 %v3405_v61, %v690_v35  ;;  %v852_v17 = vpack.c.bf16 %v834_v43, %v828_v42  ;;  %v836_v61 = vsel %vm716_vm9, %v3439_v30, %v2493_v36  ;;  %v2918_v50 = vpop.eup %2917  ;;  %v2866_v42 = vld [vmem:[%s4641_s2 + $0x224] ss:$8 sps:$4 sm:$0xff]  }
 0x119   : > { %v692_v44 = vpop.f32.mrf.mxu0  ;;  %v2920_v53 = vpop.eup %2919  ;;  %v829_v30 = vsel %vm709_vm3, %v3413_v4, %v2486_v33  ;;  %v854_v54 = vpack.c.bf16 %v836_v61, %v830_v49  ;;  %v2852_v4 = vld [vmem:[%s4641_s2 + $0x260] ss:$8 sps:$4 sm:$0xff]   ;;  %v2497_v16 = vadd.f32 -1.0, %v2918_v50  ;;  %vm711_vm2 = vcmp.gt.f32.partialorder %v3486_v27, 0.0 }
 0x11a   : > { %v763_v51 = vmul.f32 1.442695, %v735_v39  ;;  %v736_v52 = vmin.f32 %v3494_v40, 0.0  ;;  %v3514_v18 = vadd.f32 %v3407_v2, %v692_v44  ;;  %1471 = vmatprep.mubr.bf16.mxu1 %v852_v17  ;;  %v2922_v56 = vpop.eup %2921  ;;  %v853_v57 = vpack.c.bf16 %v835_v3, %v829_v30  ;;  %v2864_v49 = vld [vmem:[%s4641_s2 + $0x220] ss:$8 sps:$4 sm:$0xff]  }
 0x11b   : > { %v694_v55 = vpop.f32.mrf.mxu0  ;;  %1472 = vmatmul.mubr.bf16.vlgmr.msra.gmra.mxu1 %v851_v29  ;;  %v2924_v63 = vpop.eup %2923  ;;  %1524 = vmatprep.mubr.bf16.mxu0 %v854_v54  ;;  %v2502_v10 = vadd.f32 -1.0, %v2922_v56  ;;  %v2499_v0 = vadd.f32 -1.0, %v2920_v53  ;;  %v840_v34 = vsel %vm720_vm10, %v3453_v45, %v2497_v16  ;;  %v2863_v45 = vld [vmem:[%s4641_s2 + $0x234] ss:$8 sps:$4 sm:$0xff]   ;;  %v2867_v30 = vld [vmem:[%s4641_s2 + $0x210] ss:$8 sps:$4 sm:$0xff]  }
 0x11c   : > { %2931 = vpow2.f32 %v763_v51  ;;  %v765_v58 = vmul.f32 1.442695, %v736_v52  ;;  %v741_v62 = vmin.f32 %v3514_v18, 0.0  ;;  %1546 = vmatpush1.bf16.msra.mxu1 %v2849_v11  ;;  %v3524_v6 = vadd.f32 %v3407_v2, %v694_v55  ;;  %v2926_v8 = vpop.eup %2925  ;;  %1525 = vmatmul.mubr.bf16.vlgmr.msra.gmra.mxu0 %v853_v57  ;;  %v2869_v11 = vld [vmem:[%s4641_s2 + $0x214] ss:$8 sps:$4 sm:$0xff]  }
 0x11d   : > { %1547 = vmatprep.subr.bf16.mxu1 %v2854_v12  ;;  %v2928_v13 = vpop.eup %2927  ;;  %v2504_v14 = vadd.f32 -1.0, %v2924_v63  ;;  %v2498_v24 = vadd.f32 -1.0, %v2926_v8  ;;  %v845_v25 = vsel %vm725_vm12, %v3459_v47, %v2502_v10  ;;  %v842_v47 = vsel %vm722_vm11, %v3456_v46, %v2499_v0  ;;  %v2876_v8 = vld [vmem:[%s4641_s2 + $0x2e0] ss:$8 sps:$4 sm:$0xff]   ;;  %v2881_v10 = vld [vmem:[%s4641_s2 + $0x2d4] ss:$8 sps:$4 sm:$0xff]  }
 0x11e   : > { %v775_v9 = vmul.f32 1.442695, %v741_v62  ;;  %2933 = vpow2.f32 %v765_v58  ;;  %v742_v2 = vmin.f32 %v3524_v6, 0.0  ;;  %v2930_v15 = vpop.eup %2929  ;;  %v2503_v22 = vadd.f32 -1.0, %v2928_v13  ;;  %v2870_v58 = vld [vmem:[%s4641_s2 + $0x200] ss:$8 sps:$4 sm:$0xff]  }
 0x11f   : > { %v2505_v23 = vadd.f32 -1.0, %v2930_v15  ;;  %v847_v33 = vsel %vm727_vm13, %v3462_v48, %v2504_v14  ;;  %v2858_v48 = vld [vmem:[%s4641_s2 + $0x240] ss:$8 sps:$4 sm:$0xff]   ;;  %vm717_vm3 = vcmp.gt.f32.partialorder %v3514_v18, 0.0  ;;  %vm712_vm4 = vcmp.gt.f32.partialorder %v3494_v40, 0.0 }
 0x120   : > { %2935 = vpow2.f32 %v775_v9  ;;  %v777_v21 = vmul.f32 1.442695, %v742_v2  ;;  %1548 = vmatpush1.bf16.msra.mxu1 %v2852_v4  ;;  %v846_v28 = vsel %vm726_vm14, %v3470_v59, %v2503_v22  ;;  %v839_v59 = vsel %vm719_vm0, %v3442_v31, %v2496_v20  ;;  %v698_v31 = vpop.f32.mrf.mxu0  ;;  %v2875_v62 = vld [vmem:[%s4641_s2 + $0x2f4] ss:$8 sps:$4 sm:$0xff]   ;;  %v2878_v4 = vld [vmem:[%s4641_s2 + $0x2e4] ss:$8 sps:$4 sm:$0xff]  }
 0x121   : > { %1549 = vmatprep.subr.bf16.mxu1 %v2857_v7  ;;  %v848_v32 = vsel %vm728_vm15, %v3473_v60, %v2505_v23  ;;  %v858_v35 = vpack.c.bf16 %v846_v28, %v840_v34  ;;  %v841_v60 = vsel %vm721_vm1, %v3448_v38, %v2498_v24  ;;  %v857_v37 = vpack.c.bf16 %v845_v25, %v839_v59  ;;  %v2861_v38 = vld [vmem:[%s4641_s2 + $0x230] ss:$8 sps:$4 sm:$0xff]   ;;  %v2884_v0 = vld [vmem:[%s4641_s2 + $0x2c4] ss:$8 sps:$4 sm:$0xff]   ;;  %v2888_v25 = vld [vmem:[%s4641_s2 + $0x2a0] ss:$8 sps:$4 sm:$0xff]  }
 0x122   : > { %2937 = vpow2.f32 %v777_v21  ;;  %v860_v36 = vpack.c.bf16 %v848_v32, %v842_v47  ;;  %v859_v39 = vpack.c.bf16 %v847_v33, %v841_v60  ;;  %v700_v17 = vpop.f32.mrf.mxu0  ;;  %vm718_vm5 = vcmp.gt.f32.partialorder %v3524_v6, 0.0  ;;  %v2879_v15 = vld [vmem:[%s4641_s2 + $0x2d0] ss:$8 sps:$4 sm:$0xff]   ;;  %v2890_v24 = vld [vmem:[%s4641_s2 + $0x2a4] ss:$8 sps:$4 sm:$0xff]  }
 0x123   : > { %1481 = vmatprep.mubr.bf16.mxu1 %v858_v35  ;;  %v699_v14 = vadd.f32 %v3431_v5, %v698_v31  ;;  %v2885_v23 = vld [vmem:[%s4641_s2 + $0x2b0] ss:$8 sps:$4 sm:$0xff]   ;;  %v2896_v33 = vld [vmem:[%s4641_s2 + $0x284] ss:$8 sps:$4 sm:$0xff]   ;;  %v2894_v35 = vld [vmem:[%s4641_s2 + $0x280] ss:$8 sps:$4 sm:$0xff]  }
 0x124   : > { %1550 = vmatpush1.bf16.msra.mxu1 %v2855_v19  ;;  %1534 = vmatprep.mubr.bf16.mxu0 %v860_v36  ;;  %v702_v53 = vpop.f32.mrf.mxu0  ;;  %v2891_v32 = vld [vmem:[%s4641_s2 + $0x290] ss:$8 sps:$4 sm:$0xff]  }
 0x125   : > { %1551 = vmatprep.subr.bf16.mxu1 %v2860_v26  ;;  %1482 = vmatmul.mubr.bf16.gmra.mxu1 %v857_v37  ;;  %v703_v13 = vadd.f32 %v3450_v41, %v702_v53  ;;  %v747_v20 = vmin.f32 %v699_v14, 0.0  ;;  %v2893_v26 = vld [vmem:[%s4641_s2 + $0x294] ss:$8 sps:$4 sm:$0xff]   ;;  %vm723_vm9 = vcmp.gt.f32.partialorder %v699_v14, 0.0 }
 0x126   : > { %1535 = vmatmul.mubr.bf16.gmra.mxu0 %v859_v39  ;;  %v704_v57 = vpop.f32.mrf.mxu0 }
 0x127   : > { %v705_v63 = vadd.f32 %v3450_v41, %v704_v57  ;;  %v753_v19 = vmin.f32 %v703_v13, 0.0  ;;  %v2882_v41 = vld [vmem:[%s4641_s2 + $0x2c0] ss:$8 sps:$4 sm:$0xff]   ;;  %v787_v22 = vmul.f32 1.442695, %v747_v20  ;;  %vm729_vm8 = vcmp.gt.f32.partialorder %v703_v13, 0.0 }
 0x128   : > { %1552 = vmatpush1.bf16.msra.mxu1 %v2858_v48 }
 0x129   : > { %v2932_v46 = vpop.eup %2931  ;;  %1553 = vmatprep.subr.bf16.mxu1 %v2863_v45  ;;  %v754_v7 = vmin.f32 %v705_v63, 0.0  ;;  %v799_v21 = vmul.f32 1.442695, %v753_v19  ;;  %vm730_vm6 = vcmp.gt.f32.partialorder %v705_v63, 0.0 }
 0x12a   : > { %v2488_v3 = vadd.f32 -1.0, %v2932_v46 }
 0x12b   : > { %v2934_v43 = vpop.eup %2933  ;;  %v801_v2 = vmul.f32 1.442695, %v754_v7 }
 0x12c   : > { %1554 = vmatpush1.bf16.msra.mxu1 %v2861_v38  ;;  %v2489_v50 = vadd.f32 -1.0, %v2934_v43  ;;  %v3582_v51 = vsel %vm711_vm2, %v3486_v27, %v2488_v3  ;;  %v2872_v27 = vld [vmem:[%s4641_s2 + $0x204] ss:$8 sps:$4 sm:$0xff]  }
 0x12d   : > { %v2936_v44 = vpop.eup %2935  ;;  %1555 = vmatprep.subr.bf16.mxu1 %v2866_v42  ;;  %2939 = vpow2.f32 %v801_v2 }
 0x12e   : > { %v2494_v61 = vadd.f32 -1.0, %v2936_v44 }
 0x12f   : > { %v2938_v29 = vpop.eup %2937 }
 0x130   : > { %v3585_v52 = vsel %vm717_vm3, %v3514_v18, %v2494_v61  ;;  %1556 = vmatpush1.bf16.msra.mxu1 %v2864_v49  ;;  %v2495_v54 = vadd.f32 -1.0, %v2938_v29  ;;  %v832_v18 = vsel %vm712_vm4, %v3494_v40, %v2489_v50  ;;  %v2873_v40 = vld [vmem:[%s4641_s2 + $0x2f0] ss:$8 sps:$4 sm:$0xff]   ;;  %vm1986_vm4 = vcmask 785408  }
 0x131   : > { %v855_v12 = vpack.c.bf16 %v3585_v52, %v3582_v51  ;;  %1557 = vmatprep.subr.bf16.mxu1 %v2869_v11 }
 0x132   : > { %v838_v55 = vsel %vm718_vm5, %v3524_v6, %v2495_v54  ;;  %v701_v6 = vadd.f32 %v3431_v5, %v700_v17  ;;  %v2887_v5 = vld [vmem:[%s4641_s2 + $0x2b4] ss:$8 sps:$4 sm:$0xff]  }
 0x133   : > { %v856_v56 = vpack.c.bf16 %v838_v55, %v832_v18 }
 0x134   : > { %1558 = vmatpush1.bf16.msra.mxu1 %v2867_v30  ;;  %v748_v9 = vmin.f32 %v701_v6, 0.0  ;;  %vm724_vm7 = vcmp.gt.f32.partialorder %v701_v6, 0.0 }
 0x135   : > { %1559 = vmatprep.subr.bf16.mxu1 %v2872_v27  ;;  %1577 = vmatprep.mubr.bf16.mxu1 %v856_v56 }
 0x136   : > { %v789_v16 = vmul.f32 1.442695, %v748_v9 }
 0x138   : > { %1560 = vmatpush1.bf16.msra.mxu1 %v2870_v58  ;;  %2941 = vpow2.f32 %v789_v16 }
 0x139   : > { %1561 = vmatprep.subr.bf16.mxu1 %v2875_v62  ;;  %2943 = vpow2.f32 %v799_v21 }
 0x13a   : > { %2945 = vpow2.f32 %v787_v22  ;;  %v2940_v28 = vpop.eup %2939 }
 0x13b   : > { %v2507_v47 = vadd.f32 -1.0, %v2940_v28 }
 0x13c   : > { %1562 = vmatpush2.bf16.msra.mxu1 %v2873_v40 }
 0x13d   : > { %1563 = vmatprep.subr.bf16.mxu1 %v2878_v4  ;;  %v850_v60 = vsel %vm730_vm6, %v705_v63, %v2507_v47 }
 0x140   : > { %1564 = vmatpush2.bf16.msra.mxu1 %v2876_v8 }
 0x141   : > { %1565 = vmatprep.subr.bf16.mxu1 %v2881_v10 }
 0x144   : > { %1566 = vmatpush2.bf16.msra.mxu1 %v2879_v15 }
 0x145   : > { %1567 = vmatprep.subr.bf16.mxu1 %v2884_v0  ;;  %v2942_v34 = vpop.eup %2941 }
 0x146   : > { %v2501_v36 = vadd.f32 -1.0, %v2942_v34  ;;  %v2944_v59 = vpop.eup %2943 }
 0x147   : > { %v2946_v48 = vpop.eup %2945  ;;  %v2506_v45 = vadd.f32 -1.0, %v2944_v59 }
 0x148   : > { %1568 = vmatpush2.bf16.msra.mxu1 %v2882_v41  ;;  %v844_v37 = vsel %vm724_vm7, %v701_v6, %v2501_v36  ;;  %v2500_v46 = vadd.f32 -1.0, %v2946_v48 }
 0x149   : > { %1569 = vmatprep.subr.bf16.mxu1 %v2887_v5  ;;  %v862_v39 = vpack.c.bf16 %v850_v60, %v844_v37  ;;  %v849_v31 = vsel %vm729_vm8, %v703_v13, %v2506_v45 }
 0x14a   : > { %v843_v38 = vsel %vm723_vm9, %v699_v14, %v2500_v46 }
 0x14b   : > { %v861_v42 = vpack.c.bf16 %v849_v31, %v843_v38 }
 0x14c   : > { %1570 = vmatpush2.bf16.msra.mxu1 %v2885_v23 }
 0x14d   : > { %1571 = vmatprep.subr.bf16.mxu1 %v2890_v24 }
 0x150   : > { %1572 = vmatpush2.bf16.msra.mxu1 %v2888_v25 }
 0x151   : > { %1573 = vmatprep.subr.bf16.mxu1 %v2893_v26 }
 0x154   : > { %1574 = vmatpush2.bf16.msra.mxu1 %v2891_v32 }
 0x155   : > { %1575 = vmatprep.subr.bf16.mxu1 %v2896_v33 }
 0x158   : > { %1576 = vmatpush2.bf16.msra.mxu1 %v2894_v35 }
 0x15b   : > { %1578 = vmatmul.mubr.bf16.vlgmr.msra.gmra.mxu1 %v855_v12 }
 0x15c   : > { %1587 = vmatprep.mubr.bf16.mxu1 %v862_v39 }
 0x163   : > { %1588 = vmatmul.mubr.bf16.gmra.mxu1 %v861_v42 }
 0x164   : > { %2604 = vmatprep.mubr.msk.f32.mxu1 %vm1986_vm4, %v1953_v1 }
 0x1db   : > { %v1473_v43 = vpop.f32.mrf.mxu1 }
 0x1dc   : > { %v1526_v11 = vpop.f32.mrf.mxu0 }
 0x1dd   : > { %v1475_v3 = vpop.f32.mrf.mxu1  ;;  %v1527_v52 = vadd.f32 %v1526_v11, %v1473_v43  ;;  %v4646_v11 = vlaneseq }
 0x1de   : > { %v1528_v29 = vpop.f32.mrf.mxu0 }
 0x1df   : > { %v1477_v44 = vpop.f32.mrf.mxu1  ;;  %v1529_v53 = vadd.f32 %v1528_v29, %v1475_v3 }
 0x1e0   : > { %v1530_v18 = vpop.f32.mrf.mxu0 }
 0x1e1   : > { %v1479_v17 = vpop.f32.mrf.mxu1  ;;  %v1531_v57 = vadd.f32 %v1530_v18, %v1477_v44 }
 0x1e2   : > { %v1532_v56 = vpop.f32.mrf.mxu0 }
 0x1e3   : > { %v1533_v62 = vadd.f32 %v1532_v56, %v1479_v17 }
 0x1e5   : > { %v3657_v49 = vpop.f32.mrf.mxu1 }
 0x1e6   : > { %v1536_v6 = vpop.f32.mrf.mxu0 }
 0x1e7   : > { %v3659_v61 = vpop.f32.mrf.mxu1  ;;  %v1537_v8 = vadd.f32 %v1536_v6, %v3657_v49 }
 0x1e8   : > { %v1538_v7 = vpop.f32.mrf.mxu0 }
 0x1e9   : > { %v3661_v50 = vpop.f32.mrf.mxu1  ;;  %v1539_v10 = vadd.f32 %v1538_v7, %v3659_v61 }
 0x1ea   : > { %v1540_v47 = vpop.f32.mrf.mxu0 }
 0x1eb   : > { %v3663_v51 = vpop.f32.mrf.mxu1  ;;  %v1541_v59 = vadd.f32 %v1540_v47, %v3661_v50 }
 0x1ec   : > { %v1542_v39 = vpop.f32.mrf.mxu0 }
 0x1ed   : > { %v1543_v31 = vadd.f32 %v1542_v39, %v3663_v51  ;;  %v3922_v51 = vand.u32 127, %v4646_v11 }
 0x1ef   : > { %vm1641_vm10 = vcmp.lt.s32.totalorder %v3922_v51, 6  ;;  %vm1841_vm11 = vcmp.lt.s32.totalorder %v3922_v51, 125  ;;  %vm1616_vm12 = vcmp.lt.s32.totalorder %v3922_v51, 7  ;;  %vm1816_vm13 = vcmp.lt.s32.totalorder %v3922_v51, 126 }
 0x1f0   : > { %vm1791_vm14 = vcmp.lt.s32.totalorder %v3922_v51, 127  ;;  %vm1766_vm15 = vcmp.lt.s32.totalorder %v3922_v51, 1  ;;  %vm1941_vm0 = vcmp.lt.s32.totalorder %v3922_v51, 121  ;;  %vm1741_vm1 = vcmp.lt.s32.totalorder %v3922_v51, 2 }
 0x1f1   : > { %vm1916_vm2 = vcmp.lt.s32.totalorder %v3922_v51, 122  ;;  %vm1716_vm3 = vcmp.lt.s32.totalorder %v3922_v51, 3  ;;  %vm1691_vm5 = vcmp.lt.s32.totalorder %v3922_v51, 4  ;;  %vm1666_vm6 = vcmp.lt.s32.totalorder %v3922_v51, 5 }
 0x1f2   : > { %vm1866_vm7 = vcmp.lt.s32.totalorder %v3922_v51, 124  ;;  %vm1891_vm8 = vcmp.lt.s32.totalorder %v3922_v51, 123 }
 0x21b   : > { %v1579_v12 = vpop.f32.mrf.mxu1 }
 0x21c   : > { %v3665_v30 = vadd.f32 %v1579_v12, %v1527_v52 }
 0x21d   : > { %v1581_v54 = vpop.f32.mrf.mxu1 }
 0x21e   : > { %4677 = vst [vmem:[#allocation5_spill] sm:$0xff] %v3665_v30  ;;  %v3667_v27 = vadd.f32 %v1581_v54, %v1529_v53  ;;  %1675 = vrot.lane.b32.xlu0 %v3665_v30, %s3027_s16 }
 0x21f   : > { %v1583_v55 = vpop.f32.mrf.mxu1 }
 0x220   : > { %4678 = vst [vmem:[#allocation6_spill] sm:$0xff] %v3667_v27  ;;  %1683 = vrot.lane.b32.xlu1 %v3667_v27, %s3027_s16  ;;  %v3715_v63 = vadd.f32 %v1583_v55, %v1531_v57 }
 0x221   : > { %v1585_v58 = vpop.f32.mrf.mxu1 }
 0x222   : > { %1650 = vrot.lane.b32.xlu0 %v3665_v30, %s3028_s18  ;;  %v3719_v40 = vadd.f32 %v1585_v58, %v1533_v62 }
 0x223   : > { %v1589_v4 = vpop.f32.mrf.mxu1 }
 0x224   : > { %1658 = vrot.lane.b32.xlu1 %v3667_v27, %s3028_s18  ;;  %v3773_v13 = vadd.f32 %v1589_v4, %v1537_v8 }
 0x225   : > { %v1591_v9 = vpop.f32.mrf.mxu1 }
 0x226   : > { %1850 = vrot.lane.b32.xlu0 %v3665_v30, %s3029_s19  ;;  %v3777_v2 = vadd.f32 %v1591_v9, %v1539_v10 }
 0x227   : > { %v1593_v36 = vpop.f32.mrf.mxu1 }
 0x228   : > { %1858 = vrot.lane.b32.xlu1 %v3667_v27, %s3029_s19  ;;  %v3874_v48 = vadd.f32 %v1593_v36, %v1541_v59 }
 0x229   : > { %v1595_v46 = vpop.f32.mrf.mxu1 }
 0x22a   : > { %1625 = vrot.lane.b32.xlu0 %v3665_v30, %s3030_s20  ;;  %v3889_v42 = vadd.f32 %v1595_v46, %v1543_v31 }
 0x22c   : > { %1633 = vrot.lane.b32.xlu1 %v3667_v27, %s3030_s20 }
 0x22e   : > { %1825 = vrot.lane.b32.xlu0 %v3665_v30, %s3031_s26 }
 0x230   : > { %1833 = vrot.lane.b32.xlu1 %v3667_v27, %s3031_s26 }
 0x232   : > { %1598 = vrot.lane.b32.xlu0 %v3665_v30, %s3032_s28 }
 0x234   : > { %1606 = vrot.lane.b32.xlu1 %v3667_v27, %s3032_s28 }
 0x236   : > { %1800 = vrot.lane.b32.xlu0 %v3665_v30, %s3033_s29 }
 0x238   : > { %1808 = vrot.lane.b32.xlu1 %v3667_v27, %s3033_s29 }
 0x23a   : > { %1775 = vrot.lane.b32.xlu0 %v3665_v30, %s3034_s17 }
 0x23c   : > { %1783 = vrot.lane.b32.xlu1 %v3667_v27, %s3034_s17 }
 0x23e   : > { %1750 = vrot.lane.b32.xlu0 %v3665_v30, %s3035_s9 }
 0x240   : > { %1758 = vrot.lane.b32.xlu1 %v3667_v27, %s3035_s9 }
 0x242   : > { %1925 = vrot.lane.b32.xlu0 %v3665_v30, %s3036_s10 }
 0x244   : > { %1933 = vrot.lane.b32.xlu1 %v3667_v27, %s3036_s10 }
 0x246   : > { %1725 = vrot.lane.b32.xlu0 %v3665_v30, %s3037_s11 }
 0x248   : > { %1733 = vrot.lane.b32.xlu1 %v3667_v27, %s3037_s11 }
 0x24a   : > { %1900 = vrot.lane.b32.xlu0 %v3665_v30, %s3038_s12 }
 0x24c   : > { %1908 = vrot.lane.b32.xlu1 %v3667_v27, %s3038_s12 }
 0x24e   : > { %1677 = vrot.lane.b32.xlu0 %v3715_v63, %s3027_s16 }
 0x250   : > { %1685 = vrot.lane.b32.xlu1 %v3719_v40, %s3027_s16 }
 0x252   : > { %1652 = vrot.lane.b32.xlu0 %v3715_v63, %s3028_s18 }
 0x254   : > { %1660 = vrot.lane.b32.xlu1 %v3719_v40, %s3028_s18 }
 0x256   : > { %1852 = vrot.lane.b32.xlu0 %v3715_v63, %s3029_s19 }
 0x258   : > { %1860 = vrot.lane.b32.xlu1 %v3719_v40, %s3029_s19 }
 0x25a   : > { %1627 = vrot.lane.b32.xlu0 %v3715_v63, %s3030_s20 }
 0x25c   : > { %1635 = vrot.lane.b32.xlu1 %v3719_v40, %s3030_s20 }
 0x25e   : > { %1827 = vrot.lane.b32.xlu0 %v3715_v63, %s3031_s26 }
 0x260   : > { %1835 = vrot.lane.b32.xlu1 %v3719_v40, %s3031_s26 }
 0x262   : > { %1600 = vrot.lane.b32.xlu0 %v3715_v63, %s3032_s28 }
 0x264   : > { %1608 = vrot.lane.b32.xlu1 %v3719_v40, %s3032_s28 }
 0x266   : > { %1802 = vrot.lane.b32.xlu0 %v3715_v63, %s3033_s29 }
 0x268   : > { %1810 = vrot.lane.b32.xlu1 %v3719_v40, %s3033_s29 }
 0x26a   : > { %1777 = vrot.lane.b32.xlu0 %v3715_v63, %s3034_s17 }
 0x26c   : > { %1785 = vrot.lane.b32.xlu1 %v3719_v40, %s3034_s17 }
 0x26e   : > { %1752 = vrot.lane.b32.xlu0 %v3715_v63, %s3035_s9 }
 0x270   : > { %1760 = vrot.lane.b32.xlu1 %v3719_v40, %s3035_s9 }
 0x272   : > { %1927 = vrot.lane.b32.xlu0 %v3715_v63, %s3036_s10 }
 0x274   : > { %1935 = vrot.lane.b32.xlu1 %v3719_v40, %s3036_s10 }
 0x276   : > { %1727 = vrot.lane.b32.xlu0 %v3715_v63, %s3037_s11 }
 0x278   : > { %1735 = vrot.lane.b32.xlu1 %v3719_v40, %s3037_s11 }
 0x27a   : > { %1902 = vrot.lane.b32.xlu0 %v3715_v63, %s3038_s12 }
 0x27c   : > { %1910 = vrot.lane.b32.xlu1 %v3719_v40, %s3038_s12 }
 0x27e   : > { %1702 = vrot.lane.b32.xlu0 %v3715_v63, %s3039_s13 }
 0x280   : > { %1710 = vrot.lane.b32.xlu1 %v3719_v40, %s3039_s13 }
 0x282   : > { %1679 = vrot.lane.b32.xlu0 %v3773_v13, %s3027_s16 }
 0x284   : > { %1687 = vrot.lane.b32.xlu1 %v3777_v2, %s3027_s16 }
 0x286   : > { %1654 = vrot.lane.b32.xlu0 %v3773_v13, %s3028_s18 }
 0x288   : > { %1662 = vrot.lane.b32.xlu1 %v3777_v2, %s3028_s18 }
 0x28a   : > { %1854 = vrot.lane.b32.xlu0 %v3773_v13, %s3029_s19 }
 0x28c   : > { %1862 = vrot.lane.b32.xlu1 %v3777_v2, %s3029_s19 }
 0x28e   : > { %1629 = vrot.lane.b32.xlu0 %v3773_v13, %s3030_s20 }
 0x290   : > { %1637 = vrot.lane.b32.xlu1 %v3777_v2, %s3030_s20  ;;  %v3795_v14 = vpop.permute.xlu0 %1675 }
 0x292   : > { %v3797_v15 = vpop.permute.xlu1 %1683  ;;  %1829 = vrot.lane.b32.xlu0 %v3773_v13, %s3031_s26 }
 0x294   : > { %1837 = vrot.lane.b32.xlu1 %v3777_v2, %s3031_s26  ;;  %v3803_v16 = vpop.permute.xlu0 %1650 }
 0x296   : > { %v3805_v0 = vpop.permute.xlu1 %1658  ;;  %1602 = vrot.lane.b32.xlu0 %v3773_v13, %s3032_s28 }
 0x298   : > { %1610 = vrot.lane.b32.xlu1 %v3777_v2, %s3032_s28  ;;  %v3811_v19 = vpop.permute.xlu0 %1850 }
 0x29a   : > { %v3813_v20 = vpop.permute.xlu1 %1858  ;;  %1804 = vrot.lane.b32.xlu0 %v3773_v13, %s3033_s29 }
 0x29c   : > { %1812 = vrot.lane.b32.xlu1 %v3777_v2, %s3033_s29  ;;  %v3819_v41 = vpop.permute.xlu0 %1625 }
 0x29e   : > { %v3821_v5 = vpop.permute.xlu1 %1633  ;;  %1779 = vrot.lane.b32.xlu0 %v3773_v13, %s3034_s17 }
 0x2a0   : > { %1787 = vrot.lane.b32.xlu1 %v3777_v2, %s3034_s17  ;;  %v3827_v21 = vpop.permute.xlu0 %1825 }
 0x2a2   : > { %v3829_v22 = vpop.permute.xlu1 %1833  ;;  %1754 = vrot.lane.b32.xlu0 %v3773_v13, %s3035_s9 }
 0x2a4   : > { %1762 = vrot.lane.b32.xlu1 %v3777_v2, %s3035_s9  ;;  %v3835_v23 = vpop.permute.xlu0 %1598 }
 0x2a6   : > { %v3837_v24 = vpop.permute.xlu1 %1606  ;;  %1929 = vrot.lane.b32.xlu0 %v3773_v13, %s3036_s10 }
 0x2a8   : > { %1937 = vrot.lane.b32.xlu1 %v3777_v2, %s3036_s10  ;;  %v3843_v25 = vpop.permute.xlu0 %1800 }
 0x2aa   : > { %v3845_v26 = vpop.permute.xlu1 %1808  ;;  %1729 = vrot.lane.b32.xlu0 %v3773_v13, %s3037_s11 }
 0x2ac   : > { %1737 = vrot.lane.b32.xlu1 %v3777_v2, %s3037_s11  ;;  %v3851_v28 = vpop.permute.xlu0 %1775 }
 0x2ad   : > { %4679 = vst [vmem:[#allocation7_spill] sm:$0xff] %v3851_v28 }
 0x2ae   : > { %v3853_v32 = vpop.permute.xlu1 %1783  ;;  %1904 = vrot.lane.b32.xlu0 %v3773_v13, %s3038_s12 }
 0x2af   : > { %4680 = vst [vmem:[#allocation8_spill] sm:$0xff] %v3853_v32 }
 0x2b0   : > { %1912 = vrot.lane.b32.xlu1 %v3777_v2, %s3038_s12  ;;  %v3859_v33 = vpop.permute.xlu0 %1750 }
 0x2b1   : > { %4681 = vst [vmem:[#allocation9_spill] sm:$0xff] %v3859_v33 }
 0x2b2   : > { %v3861_v34 = vpop.permute.xlu1 %1758  ;;  %1704 = vrot.lane.b32.xlu0 %v3773_v13, %s3039_s13 }
 0x2b3   : > { %4682 = vst [vmem:[#allocation10_spill] sm:$0xff] %v3861_v34 }
 0x2b4   : > { %1712 = vrot.lane.b32.xlu1 %v3777_v2, %s3039_s13  ;;  %v3867_v35 = vpop.permute.xlu0 %1925 }
 0x2b5   : > { %4683 = vst [vmem:[#allocation11_spill] sm:$0xff] %v3867_v35 }
 0x2b6   : > { %v3870_v60 = vpop.permute.xlu1 %1933  ;;  %1879 = vrot.lane.b32.xlu0 %v3773_v13, %s3040_s14 }
 0x2b7   : > { %4684 = vst [vmem:[#allocation12_spill] sm:$0xff] %v3870_v60 }
 0x2b8   : > { %1887 = vrot.lane.b32.xlu1 %v3777_v2, %s3040_s14  ;;  %v3878_v37 = vpop.permute.xlu0 %1725 }
 0x2b9   : > { %4685 = vst [vmem:[#allocation13_spill] sm:$0xff] %v3878_v37  ;;  %v4084_v37 = vld [vmem:[%s4642_s3 + $0x38] sm:$0xff] }
 0x2ba   : > { %v3880_v45 = vpop.permute.xlu1 %1733  ;;  %1656 = vrot.lane.b32.xlu0 %v3874_v48, %s3028_s18  ;;  %4700 = vst [vmem:[#allocation28_spill] sm:$0xff] %v4084_v37 }
 0x2bb   : > { %4686 = vst [vmem:[#allocation14_spill] sm:$0xff] %v3880_v45  ;;  %v3041_v45 = vmov 96  }
 0x2bc   : > { %1681 = vrot.lane.b32.xlu1 %v3874_v48, %s3027_s16  ;;  %v3887_v38 = vpop.permute.xlu0 %1900  ;;  %2688 = vset.pattern.permute.xlu0 %v3041_v45 }
 0x2bd   : > { %4687 = vst [vmem:[#allocation15_spill] sm:$0xff] %v3887_v38  ;;  %2689 = vset.pattern.permute.xlu1 %v3041_v45 }
 0x2be   : > { %v3891_v43 = vpop.permute.xlu1 %1908  ;;  %1856 = vrot.lane.b32.xlu0 %v3874_v48, %s3029_s19 }
 0x2bf   : > { %4688 = vst [vmem:[#allocation16_spill] sm:$0xff] %v3891_v43 }
 0x2c0   : > { %v3895_v3 = vpop.permute.xlu0 %1677  ;;  %1689 = vrot.lane.b32.xlu1 %v3889_v42, %s3027_s16  ;;  %s2967_s16 = sshll.u32 %s3042_s15, 4  ;;  %s2968_s16 = int_to_ptr.vmem [resolvable:$false] %s2967_s16 }
 0x2c2   : > { %v3899_v44 = vpop.permute.xlu1 %1685  ;;  %1631 = vrot.lane.b32.xlu0 %v3874_v48, %s3030_s20 }
 0x2c4   : > { %v3903_v17 = vpop.permute.xlu0 %1652  ;;  %1664 = vrot.lane.b32.xlu1 %v3889_v42, %s3028_s18 }
 0x2c6   : > { %v3907_v49 = vpop.permute.xlu1 %1660  ;;  %1831 = vrot.lane.b32.xlu0 %v3874_v48, %s3031_s26 }
 0x2c8   : > { %v3911_v61 = vpop.permute.xlu0 %1852  ;;  %1864 = vrot.lane.b32.xlu1 %v3889_v42, %s3029_s19 }
 0x2ca   : > { %v3915_v50 = vpop.permute.xlu1 %1860  ;;  %1604 = vrot.lane.b32.xlu0 %v3874_v48, %s3032_s28 }
 0x2cc   : > { %v1628_v29 = vpop.permute.xlu0 %1627  ;;  %1639 = vrot.lane.b32.xlu1 %v3889_v42, %s3030_s20 }
 0x2ce   : > { %v1636_v52 = vpop.permute.xlu1 %1635  ;;  %1806 = vrot.lane.b32.xlu0 %v3874_v48, %s3033_s29 }
 0x2cf   : > { %v3929_v12 = vsel %vm1641_vm10, %v1636_v52, %v1628_v29  ;;  %v3933_v53 = vsel %vm1641_vm10, %v1628_v29, %v1636_v52 }
 0x2d0   : > { %v1828_v54 = vpop.permute.xlu0 %1827  ;;  %1839 = vrot.lane.b32.xlu1 %v3889_v42, %s3031_s26 }
 0x2d2   : > { %v1836_v18 = vpop.permute.xlu1 %1835  ;;  %1700 = vrot.lane.b32.xlu0 %v3665_v30, %s3039_s13 }
 0x2d3   : > { %v3942_v55 = vsel %vm1841_vm11, %v1828_v54, %v1836_v18  ;;  %v3946_v56 = vsel %vm1841_vm11, %v1836_v18, %v1828_v54 }
 0x2d4   : > { %v1601_v57 = vpop.permute.xlu0 %1600  ;;  %1612 = vrot.lane.b32.xlu1 %v3889_v42, %s3032_s28  ;;  %s242_s28 = sand.u32 1, %s3015_s22  }
 0x2d6   : > { %v1609_v58 = vpop.permute.xlu1 %1608  ;;  %1781 = vrot.lane.b32.xlu0 %v3874_v48, %s3034_s17 }
 0x2d7   : > { %v3955_v62 = vsel %vm1616_vm12, %v1609_v58, %v1601_v57  ;;  %v3959_v6 = vsel %vm1616_vm12, %v1601_v57, %v1609_v58 }
 0x2d8   : > { %v1803_v4 = vpop.permute.xlu0 %1802  ;;  %1814 = vrot.lane.b32.xlu1 %v3889_v42, %s3033_s29  ;;  %s2617_s29 = sshll.u32 %s3099_s25, 4  ;;  %s2969_s25 = scalar_lea.vmem %s2968_s16, 32 }
 0x2da   : > { %v1811_v7 = vpop.permute.xlu1 %1810  ;;  %1756 = vrot.lane.b32.xlu0 %v3874_v48, %s3035_s9 }
 0x2db   : > { %v3968_v8 = vsel %vm1816_vm13, %v1803_v4, %v1811_v7  ;;  %v3972_v9 = vsel %vm1816_vm13, %v1811_v7, %v1803_v4 }
 0x2dc   : > { %v1778_v10 = vpop.permute.xlu0 %1777  ;;  %1708 = vrot.lane.b32.xlu1 %v3667_v27, %s3039_s13 }
 0x2de   : > { %v1786_v47 = vpop.permute.xlu1 %1785  ;;  %1931 = vrot.lane.b32.xlu0 %v3874_v48, %s3036_s10 }
 0x2df   : > { %v3981_v36 = vsel %vm1791_vm14, %v1778_v10, %v1786_v47  ;;  %v3985_v59 = vsel %vm1791_vm14, %v1786_v47, %v1778_v10 }
 0x2e0   : > { %4689 = vst [vmem:[#allocation17_spill] sm:$0xff] %v3981_v36  ;;  %v1753_v39 = vpop.permute.xlu0 %1752  ;;  %1789 = vrot.lane.b32.xlu1 %v3889_v42, %s3034_s17  ;;  %s243_s17 = scalar_lea.vmem [#allocation2], %s242_s28 }
 0x2e2   : > { %v1761_v46 = vpop.permute.xlu1 %1760  ;;  %1731 = vrot.lane.b32.xlu0 %v3874_v48, %s3037_s11 }
 0x2e3   : > { %v3994_v31 = vsel %vm1766_vm15, %v1761_v46, %v1753_v39  ;;  %v3998_v29 = vsel %vm1766_vm15, %v1753_v39, %v1761_v46 }
 0x2e4   : > { %4690 = vst [vmem:[#allocation18_spill] sm:$0xff] %v3994_v31  ;;  %4691 = vst [vmem:[#allocation19_spill] sm:$0xff] %v3998_v29  ;;  %v1928_v52 = vpop.permute.xlu0 %1927  ;;  %1764 = vrot.lane.b32.xlu1 %v3889_v42, %s3035_s9  ;;  %s2371_s9 = sshll.u32 %s243_s17, 4  ;;  %s2372_s9 = int_to_ptr.vmem [resolvable:$true] %s2371_s9 }
 0x2e5   : > { %p2970_p0 = scmp.lt.s32.totalorder %s2372_s9, %s2968_s16 }
 0x2e6   : > { %v1936_v54 = vpop.permute.xlu1 %1935  ;;  %1906 = vrot.lane.b32.xlu0 %v3874_v48, %s3038_s12 }
 0x2e7   : > { %v4007_v18 = vsel %vm1941_vm0, %v1928_v52, %v1936_v54  ;;  %v4011_v57 = vsel %vm1941_vm0, %v1936_v54, %v1928_v52 }
 0x2e8   : > { %4692 = vst [vmem:[#allocation20_spill] sm:$0xff] %v4007_v18  ;;  %4693 = vst [vmem:[#allocation21_spill] sm:$0xff] %v4011_v57  ;;  %v1728_v58 = vpop.permute.xlu0 %1727  ;;  %1939 = vrot.lane.b32.xlu1 %v3889_v42, %s3036_s10 }
 0x2ea   : > { %v1736_v4 = vpop.permute.xlu1 %1735  ;;  %1706 = vrot.lane.b32.xlu0 %v3874_v48, %s3039_s13 }
 0x2eb   : > { %v4020_v7 = vsel %vm1741_vm1, %v1736_v4, %v1728_v58  ;;  %v4024_v10 = vsel %vm1741_vm1, %v1728_v58, %v1736_v4 }
 0x2ec   : > { %4694 = vst [vmem:[#allocation22_spill] sm:$0xff] %v4020_v7  ;;  %4695 = vst [vmem:[#allocation23_spill] sm:$0xff] %v4024_v10  ;;  %v1903_v47 = vpop.permute.xlu0 %1902  ;;  %1739 = vrot.lane.b32.xlu1 %v3889_v42, %s3037_s11  ;;  %v4099_v10 = vld [vmem:[%s4642_s3 + $0x78] sm:$0xff] }
 0x2ed   : > { %4702 = vst [vmem:[#allocation30_spill] sm:$0xff] %v4099_v10 }
 0x2ee   : > { %v1911_v39 = vpop.permute.xlu1 %1910  ;;  %1881 = vrot.lane.b32.xlu0 %v3874_v48, %s3040_s14 }
 0x2ef   : > { %v4033_v46 = vsel %vm1916_vm2, %v1903_v47, %v1911_v39  ;;  %v4037_v52 = vsel %vm1916_vm2, %v1911_v39, %v1903_v47  ;;  %v1951_v47 = vld [vmem:[%s4642_s3 + $0x8] sm:$0xff] }
 0x2f0   : > { %4696 = vst [vmem:[#allocation24_spill] sm:$0xff] %v4033_v46  ;;  %4697 = vst [vmem:[#allocation25_spill] sm:$0xff] %v4037_v52  ;;  %v1703_v54 = vpop.permute.xlu0 %1702  ;;  %1914 = vrot.lane.b32.xlu1 %v3889_v42, %s3038_s12  ;;  %2059 = vmatprep.mubr.f32.mxu0 %v1951_v47  ;;  %v4094_v52 = vld [vmem:[%s4642_s3 + $0x58] sm:$0xff]  ;;  %s2369_s12 = scalar_lea.hbm %s4645_s6, %s2617_s29 }
 0x2f1   : > { %4701 = vst [vmem:[#allocation29_spill] sm:$0xff] %v4094_v52 }
 0x2f2   : > { %v1711_v58 = vpop.permute.xlu1 %1710  ;;  %1877 = vrot.lane.b32.xlu0 %v3715_v63, %s3040_s14 }
 0x2f3   : > { %v4046_v4 = vsel %vm1716_vm3, %v1711_v58, %v1703_v54  ;;  %v4050_v11 = vsel %vm1716_vm3, %v1703_v54, %v1711_v58 }
 0x2f4   : > { %4698 = vst [vmem:[#allocation26_spill] sm:$0xff] %v4046_v4  ;;  %4699 = vst [vmem:[#allocation27_spill] sm:$0xff] %v4050_v11  ;;  %v1680_v39 = vpop.permute.xlu0 %1679  ;;  %1714 = vrot.lane.b32.xlu1 %v3889_v42, %s3039_s13  ;;  %s2359_s13 = scalar_lea.sflag [#allocation3], %s242_s28 }
 0x2f6   : > { %v1688_v43 = vpop.permute.xlu1 %1687  ;;  %1875 = vrot.lane.b32.xlu0 %v3665_v30, %s3040_s14 }
 0x2f8   : > { %v4063_v54 = vpop.permute.xlu0 %1654  ;;  %1889 = vrot.lane.b32.xlu1 %v3889_v42, %s3040_s14 }
 0x2fa   : > { %v4067_v58 = vpop.permute.xlu1 %1662  ;;  %1968 = vperm.xlu0 %2688, %v1953_v1  }
 0x2fc   : > { %v4069_v4 = vpop.permute.xlu0 %1854  ;;  %1885 = vrot.lane.b32.xlu1 %v3719_v40, %s3040_s14 }
 0x2fe   : > { %v4073_v47 = vpop.permute.xlu1 %1862  ;;  %1983 = vperm.xlu0 %2688, %v4099_v10  }
 0x300   : > { %v4075_v11 = vpop.permute.xlu0 %1629  ;;  %1883 = vrot.lane.b32.xlu1 %v3667_v27, %s3040_s14  ;;  %s2963_s14 = scalar_lea.vmem %s2372_s9, 16 }
 0x301   : > { %p2964_p11 = scmp.ne.s32.totalorder %s2372_s9, %s2963_s14  ;;  %p2971_p1 = scmp.lt.s32.totalorder %s2969_s25, %s2963_s14 }
 0x302   : > { %v4079_v38 = vpop.permute.xlu1 %1637 }
 0x303   : > { %p2965_p12 = pnand %p2964_p11, %p3116_p5  ;;  %p2972_p2 = por %p2971_p1, %p2970_p0 }
 0x304   : > { %v4086_v46 = vpop.permute.xlu0 %1829  ;;  %1973 = vperm.xlu1 %2689, %v4084_v37   ;;  %v4703_v37 = vmov 0  }
 0x305   : > { %2690 = vset.pattern.permute.xlu0 %v4703_v37  ;;  %p2966_p13 = pneg %p2965_p12 }
 0x306   : > { %v4089_v7 = vpop.permute.xlu1 %1837 }
 0x307   : > { %p2973_p3 = pnand %p2972_p2, %p2966_p13 }
 0x308   : > { %v4101_v60 = vpop.permute.xlu0 %1602  ;;  %1978 = vperm.xlu1 %2689, %v4094_v52  }
 0x30a   : > { %v4105_v1 = vpop.permute.xlu1 %1610 }
 0x30c   : > { %v4107_v45 = vpop.permute.xlu0 %1804 }
 0x30e   : > { %v4110_v35 = vpop.permute.xlu1 %1812 }
 0x310   : > { %v4112_v33 = vpop.permute.xlu0 %1779 }
 0x312   : > { %v4114_v34 = vpop.permute.xlu1 %1787 }
 0x314   : > { %v4116_v18 = vpop.permute.xlu0 %1754 }
 0x315   : > { %4704 = vst [vmem:[#allocation31_spill] sm:$0xff] %v4116_v18 }
 0x316   : > { %v4118_v31 = vpop.permute.xlu1 %1762 }
 0x317   : > { %4705 = vst [vmem:[#allocation32_spill] sm:$0xff] %v4118_v31 }
 0x318   : > { %v4120_v57 = vpop.permute.xlu0 %1929 }
 0x319   : > { %4706 = vst [vmem:[#allocation33_spill] sm:$0xff] %v4120_v57 }
 0x31a   : > { %v4122_v10 = vpop.permute.xlu1 %1937 }
 0x31b   : > { %4707 = vst [vmem:[#allocation34_spill] sm:$0xff] %v4122_v10 }
 0x31c   : > { %v4124_v52 = vpop.permute.xlu0 %1729 }
 0x31d   : > { %4708 = vst [vmem:[#allocation35_spill] sm:$0xff] %v4124_v52 }
 0x31e   : > { %v4126_v29 = vpop.permute.xlu1 %1737 }
 0x31f   : > { %4709 = vst [vmem:[#allocation36_spill] sm:$0xff] %v4126_v29 }
 0x320   : > { %v4128_v30 = vpop.permute.xlu0 %1904 }
 0x321   : > { %4710 = vst [vmem:[#allocation37_spill] sm:$0xff] %v4128_v30 }
 0x322   : > { %v4130_v37 = vpop.permute.xlu1 %1912 }
 0x323   : > { %4711 = vst [vmem:[#allocation38_spill] sm:$0xff] %v4130_v37 }
 0x324   : > { %v4132_v27 = vpop.permute.xlu0 %1704 }
 0x325   : > { %4712 = vst [vmem:[#allocation39_spill] sm:$0xff] %v4132_v27 }
 0x326   : > { %v4134_v32 = vpop.permute.xlu1 %1712 }
 0x327   : > { %4713 = vst [vmem:[#allocation40_spill] sm:$0xff] %v4134_v32  ;;  %v1693_v32 = vsel %vm1691_vm5, %v3895_v3, %v3899_v44 }
 0x328   : > { %v4136_v28 = vpop.permute.xlu0 %1879 }
 0x329   : > { %4714 = vst [vmem:[#allocation41_spill] sm:$0xff] %v4136_v28  ;;  %v1694_v28 = vsel %vm1691_vm5, %v1680_v39, %v1688_v43 }
 0x32a   : > { %v4138_v18 = vpop.permute.xlu1 %1887 }
 0x32b   : > { %4715 = vst [vmem:[#allocation42_spill] sm:$0xff] %v4138_v18  ;;  %v1698_v18 = vsel %vm1691_vm5, %v1688_v43, %v1680_v39  ;;  %v1668_v39 = vsel %vm1666_vm6, %v3903_v17, %v3907_v49 }
 0x32c   : > { %v1657_v31 = vpop.permute.xlu0 %1656 }
 0x32e   : > { %v1682_v57 = vpop.permute.xlu1 %1681 }
 0x330   : > { %v1857_v36 = vpop.permute.xlu0 %1856 }
 0x332   : > { %v1690_v52 = vpop.permute.xlu1 %1689 }
 0x333   : > { %v1699_v29 = vsel %vm1691_vm5, %v1690_v52, %v1682_v57  ;;  %v1695_v37 = vsel %vm1691_vm5, %v1682_v57, %v1690_v52 }
 0x334   : > { %v1632_v30 = vpop.permute.xlu0 %1631  ;;  %1995 = vmatprep.subr.mxu0 %v1695_v37  ;;  %v1667_v37 = vsel %vm1666_vm6, %v3803_v16, %v3805_v0 }
 0x335   : > { %1996 = vmatpush1.msra.mxu0 %v1699_v29  ;;  %v1697_v29 = vsel %vm1691_vm5, %v3899_v44, %v3895_v3 }
 0x336   : > { %1997 = vmatprep.subr.mxu0 %v1694_v28  ;;  %v1665_v27 = vpop.permute.xlu1 %1664  ;;  %v1692_v28 = vsel %vm1691_vm5, %v3795_v14, %v3797_v15 }
 0x337   : > { %1998 = vmatpush1.msra.mxu0 %v1698_v18  ;;  %v1670_v44 = vsel %vm1666_vm6, %v1657_v31, %v1665_v27  ;;  %v1674_v57 = vsel %vm1666_vm6, %v1665_v27, %v1657_v31  ;;  %v1673_v27 = vsel %vm1666_vm6, %v4067_v58, %v4063_v54 }
 0x338   : > { %v1832_v10 = vpop.permute.xlu0 %1831  ;;  %1999 = vmatprep.subr.mxu0 %v1693_v32  ;;  %v1696_v32 = vsel %vm1691_vm5, %v3797_v15, %v3795_v14  ;;  %v1669_v14 = vsel %vm1666_vm6, %v4063_v54, %v4067_v58  ;;  %v1873_v15 = vsel %vm1866_vm7, %v4073_v47, %v4069_v4  ;;  %v1872_v54 = vsel %vm1866_vm7, %v3915_v50, %v3911_v61 }
 0x339   : > { %2000 = vmatpush1.msra.mxu0 %v1697_v29  ;;  %v1871_v29 = vsel %vm1866_vm7, %v3813_v20, %v3811_v19  ;;  %vm2332_vm5 = vcmask 254976  }
 0x33a   : > { %2001 = vmatprep.subr.mxu0 %v1692_v28  ;;  %v1865_v43 = vpop.permute.xlu1 %1864 }
 0x33b   : > { %v1870_v3 = vsel %vm1866_vm7, %v1857_v36, %v1865_v43  ;;  %2002 = vmatpush1.msra.mxu0 %v1696_v32  ;;  %v1874_v18 = vsel %vm1866_vm7, %v1865_v43, %v1857_v36  ;;  %v1869_v36 = vsel %vm1866_vm7, %v4069_v4, %v4073_v47  ;;  %v1672_v4 = vsel %vm1666_vm6, %v3907_v49, %v3903_v17 }
 0x33c   : > { %v4175_v52 = vpop.permute.xlu0 %1604  ;;  %2003 = vmatprep.subr.mxu0 %v1670_v44  ;;  %2084 = vmatprep.subr.mxu1 %v1874_v18  ;;  %v1868_v47 = vsel %vm1866_vm7, %v3911_v61, %v3915_v50  ;;  %v1671_v49 = vsel %vm1666_vm6, %v3805_v0, %v3803_v16  ;;  %v1867_v61 = vsel %vm1866_vm7, %v3811_v19, %v3813_v20  ;;  %vm2356_vm6 = vcmask 8192  }
 0x33d   : > { %2004 = vmatpush1.msra.mxu0 %v1674_v57  ;;  %2085 = vmatpush1.msra.mxu1 %v1870_v3  ;;  %v1644_v0 = vsel %vm1641_vm10, %v4075_v11, %v4079_v38  ;;  %v1848_v19 = vsel %vm1841_vm11, %v4089_v7, %v4086_v46  ;;  %v1844_v20 = vsel %vm1841_vm11, %v4086_v46, %v4089_v7 }
 0x33e   : > { %2005 = vmatprep.subr.mxu0 %v1669_v14  ;;  %2086 = vmatprep.subr.mxu1 %v1873_v15  ;;  %v1640_v31 = vpop.permute.xlu1 %1639  ;;  %v1623_v44 = vsel %vm1616_vm12, %v4105_v1, %v4101_v60  ;;  %v1819_v18 = vsel %vm1816_vm13, %v4107_v45, %v4110_v35 }
 0x33f   : > { %2006 = vmatpush1.msra.mxu0 %v1673_v27  ;;  %2087 = vmatpush1.msra.mxu1 %v1869_v36  ;;  %v1645_v28 = vsel %vm1641_vm10, %v1632_v30, %v1640_v31  ;;  %v1649_v32 = vsel %vm1641_vm10, %v1640_v31, %v1632_v30  ;;  %v1648_v30 = vsel %vm1641_vm10, %v4079_v38, %v4075_v11  ;;  %v4721_v36 = vld [vmem:[#allocation32_spill] sm:$0xff]  ;;  %v4722_v31 = vld [vmem:[#allocation31_spill] sm:$0xff] }
 0x340   : > { %v1807_v58 = vpop.permute.xlu0 %1806  ;;  %2007 = vmatprep.subr.mxu0 %v1668_v39  ;;  %2088 = vmatprep.subr.mxu1 %v1872_v54  ;;  %v1642_v38 = vsel %vm1641_vm10, %v3819_v41, %v3821_v5  ;;  %v1846_v11 = vsel %vm1841_vm11, %v3829_v22, %v3827_v21  ;;  %v1769_v39 = vsel %vm1766_vm15, %v4722_v31, %v4721_v36  ;;  %v4723_v54 = vld [vmem:[#allocation33_spill] sm:$0xff] }
 0x341   : > { %2008 = vmatpush1.msra.mxu0 %v1672_v4  ;;  %2089 = vmatpush1.msra.mxu1 %v1868_v47  ;;  %v1773_v47 = vsel %vm1766_vm15, %v4721_v36, %v4722_v31 }
 0x342   : > { %2009 = vmatprep.subr.mxu0 %v1667_v37  ;;  %2090 = vmatprep.subr.mxu1 %v1871_v29  ;;  %v1840_v17 = vpop.permute.xlu1 %1839 }
 0x343   : > { %v1845_v50 = vsel %vm1841_vm11, %v1832_v10, %v1840_v17  ;;  %2010 = vmatpush1.msra.mxu0 %v1671_v49  ;;  %2091 = vmatpush1.msra.mxu1 %v1867_v61  ;;  %v1849_v43 = vsel %vm1841_vm11, %v1840_v17, %v1832_v10  ;;  %v4725_v49 = vld [vmem:[#allocation19_spill] sm:$0xff]  ;;  %v4726_v61 = vld [vmem:[#allocation21_spill] sm:$0xff] }
 0x344   : > { %v4233_v16 = vpop.permute.xlu0 %1700  ;;  %2011 = vmatprep.subr.mxu0 %v1645_v28  ;;  %2092 = vmatprep.subr.mxu1 %v1849_v43  ;;  %v4728_v28 = vld [vmem:[#allocation20_spill] sm:$0xff]  ;;  %v4729_v43 = vld [vmem:[#allocation10_spill] sm:$0xff] }
 0x345   : > { %2012 = vmatpush1.msra.mxu0 %v1649_v32  ;;  %2093 = vmatpush1.msra.mxu1 %v1845_v50  ;;  %v4727_v50 = vld [vmem:[#allocation18_spill] sm:$0xff]  ;;  %v4730_v32 = vld [vmem:[#allocation9_spill] sm:$0xff] }
 0x346   : > { %2013 = vmatprep.subr.mxu0 %v1644_v0  ;;  %2094 = vmatprep.subr.mxu1 %v1848_v19  ;;  %v1613_v10 = vpop.permute.xlu1 %1612  ;;  %v1767_v0 = vsel %vm1766_vm15, %v4730_v32, %v4729_v43  ;;  %v4731_v19 = vld [vmem:[#allocation11_spill] sm:$0xff] }
 0x347   : > { %2014 = vmatpush1.msra.mxu0 %v1648_v30  ;;  %2095 = vmatpush1.msra.mxu1 %v1844_v20  ;;  %v4732_v30 = vld [vmem:[#allocation12_spill] sm:$0xff] }
 0x348   : > { %v1782_v3 = vpop.permute.xlu0 %1781  ;;  %2015 = vmatprep.subr.mxu0 %v3933_v53  ;;  %2096 = vmatprep.subr.mxu1 %v3946_v56  ;;  %v1842_v53 = vsel %vm1841_vm11, %v3827_v21, %v3829_v22  ;;  %v1620_v56 = vsel %vm1616_vm12, %v4175_v52, %v1613_v10  ;;  %v1619_v21 = vsel %vm1616_vm12, %v4101_v60, %v4105_v1 }
 0x349   : > { %2016 = vmatpush1.msra.mxu0 %v3929_v12  ;;  %2097 = vmatpush1.msra.mxu1 %v3942_v55  ;;  %v1646_v12 = vsel %vm1641_vm10, %v3821_v5, %v3819_v41  ;;  %v1624_v41 = vsel %vm1616_vm12, %v1613_v10, %v4175_v52  ;;  %v1823_v22 = vsel %vm1816_vm13, %v4110_v35, %v4107_v45 }
 0x34a   : > { %2017 = vmatprep.subr.mxu0 %v1642_v38  ;;  %2098 = vmatprep.subr.mxu1 %v1846_v11  ;;  %v1815_v7 = vpop.permute.xlu1 %1814  ;;  %v1617_v35 = vsel %vm1616_vm12, %v3835_v23, %v3837_v24  ;;  %v1821_v60 = vsel %vm1816_vm13, %v3845_v26, %v3843_v25  ;;  %v1946_v20 = vsel %vm1941_vm0, %v4732_v30, %v4731_v19 }
 0x34b   : > { %v1820_v55 = vsel %vm1816_vm13, %v1807_v58, %v1815_v7  ;;  %2018 = vmatpush1.msra.mxu0 %v1646_v12  ;;  %2099 = vmatpush1.msra.mxu1 %v1842_v53  ;;  %v1824_v46 = vsel %vm1816_vm13, %v1815_v7, %v1807_v58  ;;  %v4724_v58 = vld [vmem:[#allocation34_spill] sm:$0xff]  ;;  %v1942_v38 = vsel %vm1941_vm0, %v4731_v19, %v4732_v30  ;;  %v1958_v30 = vld [vmem:[%s4642_s3 + $0x40] sm:$0xff] }
 0x34c   : > { %v1757_v5 = vpop.permute.xlu0 %1756  ;;  %2019 = vmatprep.subr.mxu0 %v1620_v56  ;;  %2100 = vmatprep.subr.mxu1 %v1824_v46  ;;  %v1948_v4 = vsel %vm1941_vm0, %v4724_v58, %v4723_v54  ;;  %v1944_v37 = vsel %vm1941_vm0, %v4723_v54, %v4724_v58  ;;  %v4734_v56 = vld [vmem:[#allocation35_spill] sm:$0xff] }
 0x34d   : > { %2020 = vmatpush1.msra.mxu0 %v1624_v41  ;;  %2101 = vmatpush1.msra.mxu1 %v1820_v55  ;;  %v4733_v55 = vld [vmem:[#allocation36_spill] sm:$0xff]  ;;  %v4735_v41 = vld [vmem:[#allocation37_spill] sm:$0xff]  ;;  %v1956_v19 = vld [vmem:[%s4642_s3 + $0x30] sm:$0xff] }
 0x34e   : > { %2021 = vmatprep.subr.mxu0 %v1619_v21  ;;  %2102 = vmatprep.subr.mxu1 %v1823_v22  ;;  %v4297_v57 = vpop.permute.xlu1 %1708  ;;  %v1744_v46 = vsel %vm1741_vm1, %v4734_v56, %v4733_v55  ;;  %v1748_v22 = vsel %vm1741_vm1, %v4733_v55, %v4734_v56 }
 0x34f   : > { %2022 = vmatpush1.msra.mxu0 %v1623_v44  ;;  %2103 = vmatpush1.msra.mxu1 %v1819_v18 }
 0x350   : > { %v1932_v52 = vpop.permute.xlu0 %1931  ;;  %2023 = vmatprep.subr.mxu0 %v3959_v6  ;;  %2104 = vmatprep.subr.mxu1 %v3972_v9  ;;  %v1817_v6 = vsel %vm1816_vm13, %v3843_v25, %v3845_v26  ;;  %v4716_v26 = vld [vmem:[#allocation17_spill] sm:$0xff] }
 0x351   : > { %2024 = vmatpush1.msra.mxu0 %v3955_v62  ;;  %2105 = vmatpush1.msra.mxu1 %v3968_v8  ;;  %v1621_v62 = vsel %vm1616_vm12, %v3837_v24, %v3835_v23  ;;  %v1798_v23 = vsel %vm1791_vm14, %v4114_v34, %v4112_v33  ;;  %v1794_v24 = vsel %vm1791_vm14, %v4112_v33, %v4114_v34 }
 0x352   : > { %2025 = vmatprep.subr.mxu0 %v1617_v35  ;;  %2106 = vmatprep.subr.mxu1 %v1821_v60  ;;  %v1790_v1 = vpop.permute.xlu1 %1789  ;;  %v4737_v35 = vld [vmem:[#allocation23_spill] sm:$0xff]  ;;  %v4738_v60 = vld [vmem:[#allocation25_spill] sm:$0xff] }
 0x353   : > { %v1795_v8 = vsel %vm1791_vm14, %v1782_v3, %v1790_v1  ;;  %2026 = vmatpush1.msra.mxu0 %v1621_v62  ;;  %2107 = vmatpush1.msra.mxu1 %v1817_v6  ;;  %v1799_v9 = vsel %vm1791_vm14, %v1790_v1, %v1782_v3  ;;  %v1771_v3 = vsel %vm1766_vm15, %v4729_v43, %v4730_v32  ;;  %v4739_v1 = vld [vmem:[#allocation22_spill] sm:$0xff]  ;;  %v4740_v62 = vld [vmem:[#allocation24_spill] sm:$0xff] }
 0x354   : > { %v1732_v45 = vpop.permute.xlu0 %1731  ;;  %2027 = vmatprep.subr.mxu0 %v3889_v42  ;;  %2108 = vmatprep.subr.mxu1 %v1799_v9  ;;  %v4718_v42 = vld [vmem:[#allocation8_spill] sm:$0xff]  ;;  %v4741_v6 = vld [vmem:[#allocation14_spill] sm:$0xff] }
 0x355   : > { %2028 = vmatpush2.msra.mxu0 %v3874_v48  ;;  %2109 = vmatpush1.msra.mxu1 %v1795_v8  ;;  %v4717_v48 = vld [vmem:[#allocation7_spill] sm:$0xff]  ;;  %v4742_v8 = vld [vmem:[#allocation13_spill] sm:$0xff] }
 0x356   : > { %2029 = vmatprep.subr.mxu0 %v3777_v2  ;;  %2110 = vmatprep.subr.mxu1 %v1798_v23  ;;  %v1765_v25 = vpop.permute.xlu1 %1764  ;;  %v1796_v33 = vsel %vm1791_vm14, %v4718_v42, %v4717_v48  ;;  %v4719_v2 = vld [vmem:[#allocation6_spill] sm:$0xff]  ;;  %v1742_v9 = vsel %vm1741_vm1, %v4742_v8, %v4741_v6  ;;  %v4744_v23 = vld [vmem:[#allocation16_spill] sm:$0xff] }
 0x357   : > { %2030 = vmatpush2.msra.mxu0 %v3773_v13  ;;  %2111 = vmatpush1.msra.mxu1 %v1794_v24  ;;  %v4720_v13 = vld [vmem:[#allocation5_spill] sm:$0xff]  ;;  %v1774_v27 = vsel %vm1766_vm15, %v1765_v25, %v1757_v5  ;;  %v1952_v32 = vld [vmem:[%s4642_s3 + $0x10] sm:$0xff] }
 0x358   : > { %2031 = vmatprep.subr.mxu0 %v3719_v40  ;;  %2112 = vmatprep.subr.mxu1 %v3985_v59  ;;  %v1907_v34 = vpop.permute.xlu0 %1906  ;;  %v1792_v40 = vsel %vm1791_vm14, %v4717_v48, %v4718_v42  ;;  %v1770_v59 = vsel %vm1766_vm15, %v1757_v5, %v1765_v25  ;;  %v4736_v5 = vld [vmem:[#allocation38_spill] sm:$0xff] }
 0x359   : > { %2032 = vmatpush2.msra.mxu0 %v3715_v63  ;;  %2113 = vmatpush1.msra.mxu1 %v4716_v26  ;;  %v1923_v21 = vsel %vm1916_vm2, %v4736_v5, %v4735_v41  ;;  %v1919_v44 = vsel %vm1916_vm2, %v4735_v41, %v4736_v5  ;;  %v1746_v26 = vsel %vm1741_vm1, %v4741_v6, %v4742_v8 }
 0x35a   : > { %2033 = vmatprep.subr.mxu0 %v4719_v2  ;;  %2114 = vmatprep.subr.mxu1 %v1796_v33  ;;  %v1940_v14 = vpop.permute.xlu1 %1939 }
 0x35b   : > { %v1945_v63 = vsel %vm1941_vm0, %v1932_v52, %v1940_v14  ;;  %2034 = vmatpush2.msra.mxu0 %v4720_v13  ;;  %2115 = vmatpush1.msra.mxu1 %v1792_v40  ;;  %v1949_v15 = vsel %vm1941_vm0, %v1940_v14, %v1932_v52  ;;  %v4745_v40 = vld [vmem:[#allocation40_spill] sm:$0xff] }
 0x35c   : > { %2035 = vmatprep.subr.mxu0 %v1770_v59  ;;  %2124 = vmatprep.subr.mxu1 %v1949_v15  ;;  %v1707_v17 = vpop.permute.xlu0 %1706  ;;  %v4747_v59 = vld [vmem:[#allocation41_spill] sm:$0xff]  ;;  %v4748_v15 = vld [vmem:[#allocation42_spill] sm:$0xff] }
 0x35d   : > { %2036 = vmatpush2.msra.mxu0 %v1774_v27  ;;  %2125 = vmatpush2.msra.mxu1 %v1945_v63  ;;  %v4746_v63 = vld [vmem:[#allocation39_spill] sm:$0xff]  ;;  %v1898_v27 = vsel %vm1891_vm8, %v4748_v15, %v4747_v59  ;;  %v1894_v31 = vsel %vm1891_vm8, %v4747_v59, %v4748_v15 }
 0x35e   : > { %2037 = vmatprep.subr.mxu0 %v1769_v39  ;;  %2126 = vmatprep.subr.mxu1 %v1948_v4  ;;  %v1740_v29 = vpop.permute.xlu1 %1739  ;;  %v1719_v13 = vsel %vm1716_vm3, %v4746_v63, %v4745_v40  ;;  %v1723_v36 = vsel %vm1716_vm3, %v4745_v40, %v4746_v63  ;;  %v4749_v4 = vld [vmem:[#allocation27_spill] sm:$0xff] }
 0x35f   : > { %2038 = vmatpush2.msra.mxu0 %v1773_v47  ;;  %2127 = vmatpush2.msra.mxu1 %v1944_v37  ;;  %v1745_v7 = vsel %vm1741_vm1, %v1732_v45, %v1740_v29  ;;  %v1749_v53 = vsel %vm1741_vm1, %v1740_v29, %v1732_v45  ;;  %v4743_v45 = vld [vmem:[#allocation15_spill] sm:$0xff]  ;;  %v4750_v47 = vld [vmem:[#allocation26_spill] sm:$0xff]  ;;  %v1717_v37 = vsel %vm1716_vm3, %v4233_v16, %v4297_v57  ;;  %v1950_v29 = vld [vmem:[%s4642_s3] sm:$0xff]  ;;  %vm2294_vm1 = vcmask 130112  }
 0x360   : > { %2039 = vmatprep.subr.mxu0 %v4725_v49  ;;  %2128 = vmatprep.subr.mxu1 %v4726_v61  ;;  %v1882_v18 = vpop.permute.xlu0 %1881  ;;  %v1921_v24 = vsel %vm1916_vm2, %v4744_v23, %v4743_v45  ;;  %v1917_v48 = vsel %vm1916_vm2, %v4743_v45, %v4744_v23 }
 0x361   : > { %2040 = vmatpush2.msra.mxu0 %v4727_v50  ;;  %2129 = vmatpush2.msra.mxu1 %v4728_v28  ;;  %v1955_v50 = vld [vmem:[%s4642_s3 + $0x28] sm:$0xff] }
 0x362   : > { %2041 = vmatprep.subr.mxu0 %v1767_v0  ;;  %2130 = vmatprep.subr.mxu1 %v1946_v20  ;;  %v1915_v10 = vpop.permute.xlu1 %1914  ;;  %v4751_v0 = vld [vmem:[#allocation28_spill] sm:$0xff]  ;;  %v1963_v20 = vld [vmem:[%s4642_s3 + $0x68] sm:$0xff] }
 0x363   : > { %v1920_v11 = vsel %vm1916_vm2, %v1907_v34, %v1915_v10  ;;  %2042 = vmatpush2.msra.mxu0 %v1771_v3  ;;  %2131 = vmatpush2.msra.mxu1 %v1942_v38  ;;  %v1924_v12 = vsel %vm1916_vm2, %v1915_v10, %v1907_v34  ;;  %v4752_v10 = vld [vmem:[#allocation29_spill] sm:$0xff]  ;;  %v1960_v3 = vld [vmem:[%s4642_s3 + $0x50] sm:$0xff]  ;;  %vm2301_vm2 = vcmask 195712  }
 0x364   : > { %2043 = vmatprep.subr.mxu0 %v1745_v7  ;;  %2132 = vmatprep.subr.mxu1 %v1924_v12  ;;  %v1878_v2 = vpop.permute.xlu0 %1877  ;;  %v1962_v38 = vld [vmem:[%s4642_s3 + $0x60] sm:$0xff]  ;;  %v1964_v7 = vld [vmem:[%s4642_s3 + $0x70] sm:$0xff] }
 0x365   : > { %2044 = vmatpush2.msra.mxu0 %v1749_v53  ;;  %2133 = vmatpush2.msra.mxu1 %v1920_v11  ;;  %v4753_v11 = vld [vmem:[#allocation30_spill] sm:$0xff] }
 0x366   : > { %2045 = vmatprep.subr.mxu0 %v1744_v46  ;;  %2134 = vmatprep.subr.mxu1 %v1923_v21  ;;  %v1715_v52 = vpop.permute.xlu1 %1714 }
 0x367   : > { %2046 = vmatpush2.msra.mxu0 %v1748_v22  ;;  %2135 = vmatpush2.msra.mxu1 %v1919_v44  ;;  %v1720_v33 = vsel %vm1716_vm3, %v1707_v17, %v1715_v52  ;;  %v1724_v14 = vsel %vm1716_vm3, %v1715_v52, %v1707_v17  ;;  %v1721_v17 = vsel %vm1716_vm3, %v4297_v57, %v4233_v16  ;;  %v1954_v16 = vld [vmem:[%s4642_s3 + $0x20] sm:$0xff]  ;;  %v1959_v57 = vld [vmem:[%s4642_s3 + $0x48] sm:$0xff]  ;;  %vm2308_vm3 = vcmask 261312  }
 0x368   : > { %2047 = vmatprep.subr.mxu0 %v4737_v35  ;;  %2136 = vmatprep.subr.mxu1 %v4738_v60  ;;  %v1876_v49 = vpop.permute.xlu0 %1875 }
 0x369   : > { %2048 = vmatpush2.msra.mxu0 %v4739_v1  ;;  %2137 = vmatpush2.msra.mxu1 %v4740_v62 }
 0x36a   : > { %2049 = vmatprep.subr.mxu0 %v1742_v9  ;;  %2138 = vmatprep.subr.mxu1 %v1921_v24  ;;  %v1890_v25 = vpop.permute.xlu1 %1889 }
 0x36b   : > { %v1895_v42 = vsel %vm1891_vm8, %v1882_v18, %v1890_v25  ;;  %2050 = vmatpush2.msra.mxu0 %v1746_v26  ;;  %2139 = vmatpush2.msra.mxu1 %v1917_v48  ;;  %v1899_v34 = vsel %vm1891_vm8, %v1890_v25, %v1882_v18 }
 0x36c   : > { %2051 = vmatprep.subr.mxu0 %v1720_v33  ;;  %2140 = vmatprep.subr.mxu1 %v1899_v34 }
 0x36d   : > { %2052 = vmatpush2.msra.mxu0 %v1724_v14  ;;  %2141 = vmatpush2.msra.mxu1 %v1895_v42 }
 0x36e   : > { %2053 = vmatprep.subr.mxu0 %v1719_v13  ;;  %2142 = vmatprep.subr.mxu1 %v1898_v27  ;;  %v1886_v39 = vpop.permute.xlu1 %1885 }
 0x36f   : > { %v1893_v54 = vsel %vm1891_vm8, %v1878_v2, %v1886_v39  ;;  %2054 = vmatpush2.msra.mxu0 %v1723_v36  ;;  %2143 = vmatpush2.msra.mxu1 %v1894_v31  ;;  %v1897_v58 = vsel %vm1891_vm8, %v1886_v39, %v1878_v2 }
 0x370   : > { %2055 = vmatprep.subr.mxu0 %v4749_v4  ;;  %2144 = vmatprep.subr.mxu1 %v1897_v58 }
 0x371   : > { %2056 = vmatpush2.msra.mxu0 %v4750_v47  ;;  %2145 = vmatpush2.msra.mxu1 %v1893_v54 }
 0x372   : > { %2057 = vmatprep.subr.mxu0 %v1717_v37  ;;  %v1884_v61 = vpop.permute.xlu1 %1883 }
 0x373   : > { %v1892_v28 = vsel %vm1891_vm8, %v1876_v49, %v1884_v61  ;;  %2058 = vmatpush2.msra.mxu0 %v1721_v17  ;;  %v1896_v43 = vsel %vm1891_vm8, %v1884_v61, %v1876_v49 }
 0x374   : > { %2060 = vmatmul.mubr.f32.vlgmr.msra.gmra.mxu0 %v1950_v29  ;;  %2146 = vmatprep.subr.mxu1 %v1896_v43 }
 0x375   : > { %2147 = vmatpush2.msra.mxu1 %v1892_v28  ;;  %2065 = vmatprep.mubr.f32.mxu0 %v1955_v50  ;;  %v1969_v12 = vpop.permute.xlu0 %1968 }
 0x376   : > { %2149 = vmatmul.mubr.f32.vlgmr.msra.gmra.mxu1 %v1952_v32 }
 0x377   : > { %2605 = vmatprep.mubr.msk.f32.mxu1 %vm1986_vm4, %v4751_v0 }
 0x378   : > { %2066 = vmatmul.mubr.f32.gmra.mxu0 %v1954_v16 }
 0x379   : > { %2071 = vmatprep.mubr.f32.mxu0 %v1959_v57  ;;  %v1984_v2 = vpop.permute.xlu0 %1983 }
 0x37a   : > { %2155 = vmatmul.mubr.f32.gmra.mxu1 %v1956_v19  ;;  %v2229_v19 = vld [vmem:[%s4643_s4 + $0x40] sm:$0xff] }
 0x37b   : > { %2606 = vmatprep.mubr.msk.f32.mxu1 %vm1986_vm4, %v4752_v10  ;;  %v2230_v10 = vld [vmem:[%s4643_s4 + $0x48] sm:$0xff] }
 0x37c   : > { %2072 = vmatmul.mubr.f32.gmra.mxu0 %v1958_v30 }
 0x37d   : > { %2077 = vmatprep.mubr.f32.mxu0 %v1963_v20 }
 0x37e   : > { %2161 = vmatmul.mubr.f32.gmra.mxu1 %v1960_v3  ;;  %v2221_v3 = vld [vmem:[%s4643_s4] sm:$0xff] }
 0x37f   : > { %2607 = vmatprep.mubr.msk.f32.mxu1 %vm1986_vm4, %v4753_v11  ;;  %v1974_v56 = vpop.permute.xlu1 %1973  ;;  %vm2329_vm4 = vcmask 1041409  }
 0x380   : > { %2078 = vmatmul.mubr.f32.gmra.mxu0 %v1962_v38  ;;  %v2222_v38 = vld [vmem:[%s4643_s4 + $0x8] sm:$0xff] }
 0x382   : > { %2167 = vmatmul.mubr.f32.gmra.mxu1 %v1964_v7 }
 0x383   : > { %v1979_v9 = vpop.permute.xlu1 %1978 }
 0x434   : > { %v2061_v53 = vpop.f32.mrf.mxu0 }
 0x435   : > { %v2062_v55 = vadd.f32 %v2061_v53, %v1969_v12 }
 0x436   : > { %v2063_v46 = vpop.f32.mrf.mxu0  ;;  %v2150_v41 = vpop.f32.mrf.mxu1 }
 0x437   : > { %v2064_v5 = vadd.f32 %v2063_v46, %v1969_v12  ;;  %v2151_v21 = vadd.f32 %v2150_v41, %v2062_v55 }
 0x438   : > { %v2067_v22 = vpop.f32.mrf.mxu0  ;;  %v2152_v44 = vpop.f32.mrf.mxu1 }
 0x439   : > { %v2181_v18 = vmin.f32 %v2151_v21, 0.0  ;;  %v2068_v52 = vadd.f32 %v2067_v22, %v1974_v56  ;;  %v2153_v35 = vadd.f32 %v2152_v44, %v2064_v5  ;;  %vm2173_vm9 = vcmp.gt.f32.partialorder %v2151_v21, 0.0  ;;  %v2231_v5 = vld [vmem:[%s4643_s4 + $0x50] sm:$0xff]  ;;  %v2232_v22 = vld [vmem:[%s4643_s4 + $0x58] sm:$0xff] }
 0x43a   : > { %v2069_v60 = vpop.f32.mrf.mxu0  ;;  %v2156_v1 = vpop.f32.mrf.mxu1  ;;  %v2223_v44 = vld [vmem:[%s4643_s4 + $0x10] sm:$0xff] }
 0x43b   : > { %v2189_v62 = vmul.f32 1.442695, %v2181_v18  ;;  %v2182_v6 = vmin.f32 %v2153_v35, 0.0  ;;  %v2070_v8 = vadd.f32 %v2069_v60, %v1974_v56  ;;  %v4519_v45 = vadd.f32 %v2156_v1, %v2068_v52  ;;  %v2224_v18 = vld [vmem:[%s4643_s4 + $0x18] sm:$0xff] }
 0x43c   : > { %v2073_v23 = vpop.f32.mrf.mxu0  ;;  %v2158_v24 = vpop.f32.mrf.mxu1  ;;  %vm2174_vm10 = vcmp.gt.f32.partialorder %v2153_v35, 0.0 }
 0x43d   : > { %2947 = vpow2.f32 %v2189_v62  ;;  %v2191_v25 = vmul.f32 1.442695, %v2182_v6  ;;  %v2074_v26 = vadd.f32 %v2073_v23, %v1979_v9  ;;  %v4521_v48 = vadd.f32 %v2158_v24, %v2070_v8 }
 0x43e   : > { %v2183_v42 = vmin.f32 %v4519_v45, 0.0  ;;  %v2075_v33 = vpop.f32.mrf.mxu0  ;;  %v2162_v34 = vpop.f32.mrf.mxu1  ;;  %vm2175_vm11 = vcmp.gt.f32.partialorder %v4519_v45, 0.0 }
 0x43f   : > { %2949 = vpow2.f32 %v2191_v25  ;;  %v2184_v14 = vmin.f32 %v4521_v48, 0.0  ;;  %v2076_v40 = vadd.f32 %v2075_v33, %v1979_v9  ;;  %v4525_v13 = vadd.f32 %v2162_v34, %v2074_v26  ;;  %v2233_v26 = vld [vmem:[%s4643_s4 + $0x60] sm:$0xff]  ;;  %v2226_v33 = vld [vmem:[%s4643_s4 + $0x28] sm:$0xff] }
 0x440   : > { %v2193_v63 = vmul.f32 1.442695, %v2183_v42  ;;  %v2079_v59 = vpop.f32.mrf.mxu0  ;;  %v2164_v15 = vpop.f32.mrf.mxu1  ;;  %vm2176_vm12 = vcmp.gt.f32.partialorder %v4521_v48, 0.0  ;;  %v2234_v42 = vld [vmem:[%s4643_s4 + $0x68] sm:$0xff] }
 0x441   : > { %v2195_v27 = vmul.f32 1.442695, %v2184_v14  ;;  %v2080_v36 = vadd.f32 %v2079_v59, %v1984_v2  ;;  %v4527_v31 = vadd.f32 %v2164_v15, %v2076_v40  ;;  %v2185_v39 = vmin.f32 %v4525_v13, 0.0 }
 0x442   : > { %2951 = vpow2.f32 %v2193_v63  ;;  %v2081_v54 = vpop.f32.mrf.mxu0  ;;  %v2168_v58 = vpop.f32.mrf.mxu1  ;;  %vm2177_vm13 = vcmp.gt.f32.partialorder %v4525_v13, 0.0 }
 0x443   : > { %2953 = vpow2.f32 %v2195_v27  ;;  %v2186_v4 = vmin.f32 %v4527_v31, 0.0  ;;  %v2082_v47 = vadd.f32 %v2081_v54, %v1984_v2  ;;  %v2197_v37 = vmul.f32 1.442695, %v2185_v39 }
 0x444   : > { %v4531_v29 = vadd.f32 %v2168_v58, %v2080_v36  ;;  %v2170_v17 = vpop.f32.mrf.mxu1  ;;  %vm2178_vm14 = vcmp.gt.f32.partialorder %v4527_v31, 0.0  ;;  %v2235_v58 = vld [vmem:[%s4643_s4 + $0x70] sm:$0xff] }
 0x445   : > { %v2199_v49 = vmul.f32 1.442695, %v2186_v4  ;;  %v4533_v61 = vadd.f32 %v2170_v17, %v2082_v47  ;;  %2955 = vpow2.f32 %v2197_v37  ;;  %v2236_v4 = vld [vmem:[%s4643_s4 + $0x78] sm:$0xff] }
 0x446   : > { %v2187_v50 = vmin.f32 %v4531_v29, 0.0  ;;  %vm2179_vm15 = vcmp.gt.f32.partialorder %v4531_v29, 0.0  ;;  %v2228_v47 = vld [vmem:[%s4643_s4 + $0x38] sm:$0xff] }
 0x447   : > { %2957 = vpow2.f32 %v2199_v49  ;;  %v2188_v28 = vmin.f32 %v4533_v61, 0.0  ;;  %vm2180_vm0 = vcmp.gt.f32.partialorder %v4533_v61, 0.0 }
 0x448   : > { %v2201_v43 = vmul.f32 1.442695, %v2187_v50 }
 0x449   : > { %v2203_v32 = vmul.f32 1.442695, %v2188_v28 }
 0x44a   : > { %v2948_v16 = vpop.eup %2947  ;;  %2959 = vpow2.f32 %v2201_v43 }
 0x44b   : > { %v2608_v57 = vadd.f32 -1.0, %v2948_v16  ;;  %2961 = vpow2.f32 %v2203_v32 }
 0x44c   : > { %v2950_v0 = vpop.eup %2949 }
 0x44d   : > { %v2213_v30 = vsel %vm2173_vm9, %v2151_v21, %v2608_v57  ;;  %v2609_v20 = vadd.f32 -1.0, %v2950_v0 }
 0x44e   : > { %v2245_v12 = vmul.f32 %v2229_v19, %v2213_v30  ;;  %v2237_v46 = vmul.f32 %v2221_v3, %v2213_v30 }
 0x44f   : > { %v2952_v11 = vpop.eup %2951  ;;  %v2214_v7 = vsel %vm2174_vm10, %v2153_v35, %v2609_v20  ;;  %v2289_v20 = vadd.s32 4294967288, %v3922_v51 }
 0x450   : > { %v2954_v53 = vpop.eup %2953  ;;  %v2610_v55 = vadd.f32 -1.0, %v2952_v11  ;;  %v2246_v56 = vmul.f32 %v2230_v10, %v2214_v7  ;;  %v2238_v41 = vmul.f32 %v2222_v38, %v2214_v7  ;;  %v4754_v10 = vlaneseq }
 0x451   : > { %v2611_v21 = vadd.f32 -1.0, %v2954_v53 }
 0x452   : > { %v2215_v52 = vsel %vm2175_vm11, %v4519_v45, %v2610_v55  ;;  %v2265_v35 = vadd.f32 %v2246_v56, %v2245_v12  ;;  %v2253_v60 = vadd.f32 %v2238_v41, %v2237_v46  ;;  %v2956_v1 = vpop.eup %2955  ;;  %v2286_v3 = vshrl.u32 %v4754_v10, 7 }
 0x453   : > { %v2216_v62 = vsel %vm2176_vm12, %v4521_v48, %v2611_v21  ;;  %v2247_v6 = vmul.f32 %v2231_v5, %v2215_v52  ;;  %v2612_v9 = vadd.f32 -1.0, %v2956_v1  ;;  %v2239_v24 = vmul.f32 %v2223_v44, %v2215_v52  ;;  %v2225_v48 = vld [vmem:[%s4643_s4 + $0x20] sm:$0xff] }
 0x454   : > { %v2958_v8 = vpop.eup %2957  ;;  %2266 = vadd.xlane.f32.xlu0 %v2265_v35  ;;  %2254 = vadd.xlane.f32.xlu1 %v2253_v60  ;;  %v2248_v23 = vmul.f32 %v2232_v22, %v2216_v62  ;;  %v2240_v25 = vmul.f32 %v2224_v18, %v2216_v62  ;;  %v2292_v7 = vsub.s32 %v2289_v20, %v2286_v3  ;;  %v2303_v12 = vadd.s32 4294967272, %v3922_v51 }
 0x455   : > { %v2613_v45 = vadd.f32 -1.0, %v2958_v8  ;;  %v2217_v34 = vsel %vm2177_vm13, %v4525_v13, %v2612_v9  ;;  %v2287_v55 = vsub.s32 %v3922_v51, %v2286_v3 }
 0x456   : > { %v2268_v2 = vadd.f32 %v2248_v23, %v2247_v6  ;;  %v2256_v14 = vadd.f32 %v2240_v25, %v2239_v24  ;;  %v2249_v59 = vmul.f32 %v2233_v26, %v2217_v34  ;;  %v2241_v39 = vmul.f32 %v2225_v48, %v2217_v34 }
 0x457   : > { %v2960_v40 = vpop.eup %2959  ;;  %v2218_v63 = vsel %vm2178_vm14, %v4527_v31, %v2613_v45  ;;  %v2227_v31 = vld [vmem:[%s4643_s4 + $0x30] sm:$0xff]  ;;  %v2306_v21 = vsub.s32 %v2303_v12, %v2286_v3 }
 0x458   : > { %v2962_v15 = vpop.eup %2961  ;;  %v2614_v27 = vadd.f32 -1.0, %v2960_v40  ;;  %2269 = vadd.xlane.f32.xlu1 %v2268_v2  ;;  %2257 = vadd.xlane.f32.xlu0 %v2256_v14  ;;  %v2250_v36 = vmul.f32 %v2234_v42, %v2218_v63  ;;  %v2242_v54 = vmul.f32 %v2226_v33, %v2218_v63 }
 0x459   : > { %v2615_v13 = vadd.f32 -1.0, %v2962_v15 }
 0x45a   : > { %v2219_v37 = vsel %vm2179_vm15, %v4531_v29, %v2614_v27  ;;  %v2271_v17 = vadd.f32 %v2250_v36, %v2249_v59  ;;  %v2259_v49 = vadd.f32 %v2242_v54, %v2241_v39  ;;  %v2616_v29 = vld [vmem:[%s4644_s5] ss:$0 sm:$0xff] }
 0x45b   : > { %v2220_v50 = vsel %vm2180_vm0, %v4533_v61, %v2615_v13  ;;  %v2251_v28 = vmul.f32 %v2235_v58, %v2219_v37  ;;  %v2243_v32 = vmul.f32 %v2227_v31, %v2219_v37  ;;  %v2296_v61 = vadd.s32 4294967280, %v3922_v51 }
 0x45c   : > { %2272 = vadd.xlane.f32.xlu1 %v2271_v17  ;;  %2260 = vadd.xlane.f32.xlu0 %v2259_v49  ;;  %v2252_v43 = vmul.f32 %v2236_v4, %v2220_v50  ;;  %v2244_v16 = vmul.f32 %v2228_v47, %v2220_v50 }
 0x45d   : > { %v2299_v53 = vsub.s32 %v2296_v61, %v2286_v3 }
 0x45e   : > { %v2274_v57 = vadd.f32 %v2252_v43, %v2251_v28  ;;  %v2262_v0 = vadd.f32 %v2244_v16, %v2243_v32 }
 0x460   : > { %2275 = vadd.xlane.f32.xlu1 %v2274_v57  ;;  %2263 = vadd.xlane.f32.xlu0 %v2262_v0 }
 0x471   : > { %2343 = vbcast.lane.b32.xlu1 %v2616_v29, 256 }
 0x4dd   : > { %v2267_v19 = vpop.xlane.xlu0 %2266  ;;  %v2255_v30 = vpop.xlane.xlu1 %2254 }
 0x4de   : > { %v2313_v18 = vrot.slane %v2267_v19, %v2287_v55  ;;  %v2288_v52 = vrot.slane %v2255_v30, %v2287_v55 }
 0x4e1   : > { %v2258_v38 = vpop.xlane.xlu0 %2257  ;;  %v2270_v11 = vpop.xlane.xlu1 %2269 }
 0x4e2   : > { %v2293_v41 = vrot.slane %v2258_v38, %v2292_v7  ;;  %v2317_v5 = vrot.slane %v2270_v11, %v2292_v7 }
 0x4e4   : > { %v2295_v1 = vsel %vm2294_vm1, %v2293_v41, %v2288_v52  ;;  %v2318_v62 = vsel %vm2294_vm1, %v2317_v5, %v2313_v18 }
 0x4e5   : > { %v2261_v56 = vpop.xlane.xlu0 %2260  ;;  %v2273_v46 = vpop.xlane.xlu1 %2272 }
 0x4e6   : > { %v2300_v22 = vrot.slane %v2261_v56, %v2299_v53  ;;  %v2322_v44 = vrot.slane %v2273_v46, %v2299_v53 }
 0x4e8   : > { %v2302_v8 = vsel %vm2301_vm2, %v2300_v22, %v2295_v1  ;;  %v2323_v9 = vsel %vm2301_vm2, %v2322_v44, %v2318_v62 }
 0x4e9   : > { %v2264_v35 = vpop.xlane.xlu0 %2263  ;;  %v2276_v60 = vpop.xlane.xlu1 %2275 }
 0x4ea   : > { %v2307_v51 = vrot.slane %v2264_v35, %v2306_v21  ;;  %v2327_v6 = vrot.slane %v2276_v60, %v2306_v21 }
 0x4ec   : > { %v2309_v23 = vsel %vm2308_vm3, %v2307_v51, %v2302_v8  ;;  %v2328_v24 = vsel %vm2308_vm3, %v2327_v6, %v2323_v9 }
 0x4ed   : > { %v2330_v25 = vsel %vm2329_vm4, %v2328_v24, %v2309_v23  ;;  %v2344_v45 = vpop.permute.xlu1 %2343 }
 0x4ee   : > { %v2333_v26 = vsel %vm2332_vm5, %v2330_v25, 0.0 }
 0x4ef   : > { %2334 = vadd.xlane.f32.xlu0 %v2333_v26 }
 0x578   : > { %v2335_v42 = vpop.xlane.xlu0 %2334 }
 0x579   : > { %v2346_v48 = vadd.f32 %v2344_v45, %v2335_v42 }
 0x57b   : > { %2349 = vperm.xlu0 %2690, %v2346_v48  }
 0x5f6   : > { %v2350_v33 = vpop.permute.xlu0 %2349 }
 0x5f7   : > { %v2354_v34 = vrot.slane %v2350_v33, %v2287_v55 }
 0x5f9   : > { %2357 = vst.msk [vmem:[%s243_s17] sm:$0x1] %vm2356_vm6, %v2354_v34 }
 0x5fa   : > { %2976 = shalt.err (!%p2973_p3)
}
 0x5fb   : > { %s2977_s18 = scalar_lea.hbm %s2369_s12, 16  ;;  %s2981_s26 = scalar_lea.hbm %s4645_s6, 32 }
 0x5fc   : > { %p2978_p4 = scmp.ne.s32.totalorder %s2369_s12, %s2977_s18  ;;  %p2982_p9 = scmp.lt.s32.totalorder %s2369_s12, %s4645_s6 }
 0x5fd   : > { %p2983_p10 = scmp.lt.s32.totalorder %s2981_s26, %s2977_s18 }
 0x5fe   : > { %p2979_p7 = pnand %p2978_p4, %p3116_p5 }
 0x5ff   : > { %p2984_p11 = por %p2983_p10, %p2982_p9 }
 0x600   : > { %p2980_p8 = pneg %p2979_p7 }
 0x602   : > { %p2985_p12 = pnand %p2984_p11, %p2980_p8 }
 0x604   : > { %2988 = shalt.err (!%p2985_p12)
}
 0x605   : > { %2621 = dma.vmem_to_hbm [thread:$0]  (%p3116_p5), %s2372_s9, 16, %s2369_s12, %s2359_s13  }
 0x606 PF: > { %p2627_p13 = scmp.ge.s32.totalorder %s3023_s24, 2  ;;  %s2383_s17 = sand.u32 1, %s3011_s21  }
 0x607   : > { %s2384_s10 = scalar_lea.sflag [#allocation3], %s2383_s17 }
 0x608   : > { %p2624_p0 = pnand %p2627_p13, %p3120_p6 }
 0x60a   : > { %p2625_p1 = pneg %p2624_p0 }
 0x60c   : > { %3006 = dma.done.wait (%p2625_p1), %s2384_s10, 16  }
 0x60d   : > { %3008 = vsyncadd (%p2625_p1), %s2384_s10, 4294967280  ;;  %p16_p2 = scmp.ge.s32.totalorder %s3103_s27, 4   ;;  %s4755_s21 = smov %s3015_s22 }
 0x60e   : > { %s4756_s22 = smov %s3019_s23  ;;  %s4757_s23 = smov %s3114_s30 }
 0x60f   : > { %s4758_s24 = smov %s3103_s27  ;;  %18 = sbr.rel (!%p16_p2) target bundleno = 3 (0x3), region = 79 }
 0x614   :  { %2388 = vsyncpa [#allocation3], 1 }
 0x615   :  { %2390 = vsyncpa [#allocation3 + $0x1], 1 }

</bundles_post_ra>
